<compile_context>
chip_gen: v7x
topology: tpu7x:2x2x1
jax: 0.10.0
libtpu: 0.0.40
codegen_flags: <defaults>
</compile_context>

<pallas_src>
import jax
import jax.numpy as jnp
from jax.experimental import pallas as pl
from jax.experimental.pallas import tpu as pltpu


def _round_up(x, m):
    return (x + m - 1) // m * m


# --------------------------------------------------------------------------------------
# Kernel A: gate_proj (low @ high) + SiLU + up_proj low-rank contraction over intermediate
# --------------------------------------------------------------------------------------
def _gate_silu_uplow_kernel(x_ref, g_lo_ref, g_hi_ref, u_lo_ref, b_ref,
                            a_sc, acc_sc):
    j = pl.program_id(1)

    @pl.when(j == 0)
    def _():
        # Low-rank gate projection: computed once per row tile, reused for every
        # intermediate chunk (stored bf16 so it feeds the MXU directly).
        a = jnp.dot(x_ref[...], g_lo_ref[...], preferred_element_type=jnp.float32)
        a_sc[...] = a.astype(a_sc.dtype)
        acc_sc[...] = jnp.zeros_like(acc_sc)

    # One chunk of gate_high -> SiLU (f32 on VPU/EUP) -> contract straight back down to
    # rank with the matching chunk of up_low; accumulate in f32.
    g = jnp.dot(a_sc[...], g_hi_ref[...], preferred_element_type=jnp.float32)
    s = g * jax.nn.sigmoid(g)  # SiLU
    acc_sc[...] += jnp.dot(s.astype(u_lo_ref.dtype), u_lo_ref[...],
                           preferred_element_type=jnp.float32)

    @pl.when(j == pl.num_programs(1) - 1)
    def _():
        b_ref[...] = acc_sc[...].astype(b_ref.dtype)


# --------------------------------------------------------------------------------------
# Kernel B: up_proj high-rank expansion + down_proj low-rank contraction + final high proj
# --------------------------------------------------------------------------------------
def _uphigh_down_kernel(b_ref, u_hi_ref, d_lo_ref, d_hi_ref, y_ref, acc_sc):
    j = pl.program_id(1)

    @pl.when(j == 0)
    def _():
        acc_sc[...] = jnp.zeros_like(acc_sc)

    u = jnp.dot(b_ref[...], u_hi_ref[...], preferred_element_type=jnp.float32)
    acc_sc[...] += jnp.dot(u.astype(d_lo_ref.dtype), d_lo_ref[...],
                           preferred_element_type=jnp.float32)

    @pl.when(j == pl.num_programs(1) - 1)
    def _():
        c = acc_sc[...].astype(d_hi_ref.dtype)
        y_ref[...] = jnp.dot(c, d_hi_ref[...],
                             preferred_element_type=jnp.float32).astype(y_ref.dtype)


# --------------------------------------------------------------------------------------
# Wrapper
# --------------------------------------------------------------------------------------
def llama_mlp_pallas(x, params, *, row_tile=256, f_tile=512,
                     compute_dtype=jnp.bfloat16,
                     vmem_limit_bytes=48 * 1024 * 1024):
    """x: [..., hidden]. params: dict of pre-transposed [in, out] weights (any float dtype)."""
    orig_shape = x.shape
    hidden = orig_shape[-1]
    x2d = x.reshape(-1, hidden)
    tokens = x2d.shape[0]

    rank = params["gate_low"].shape[1]
    inter = params["gate_high"].shape[1]

    # Tile sizes (clamped so tiny demo shapes don't over-pad; always (8,128)-legal).
    tm = min(row_tile, _round_up(tokens, 8))
    tf = min(f_tile, _round_up(inter, 128))

    t_pad = _round_up(tokens, tm)
    f_pad = _round_up(inter, tf)
    r_pad = _round_up(rank, 128)

    # Cast weights to bf16 and zero-pad rank/intermediate (zero padding is exact).
    def prep(w, rows, cols):
        w = w.astype(compute_dtype)
        return jnp.pad(w, ((0, rows - w.shape[0]), (0, cols - w.shape[1])))

    g_lo = prep(params["gate_low"],  hidden, r_pad)
    g_hi = prep(params["gate_high"], r_pad,  f_pad)
    u_lo = prep(params["up_low"],    f_pad,  r_pad)
    u_hi = prep(params["up_high"],   r_pad,  f_pad)
    d_lo = prep(params["down_low"],  f_pad,  r_pad)
    d_hi = prep(params["down_high"], r_pad,  hidden)

    xq = x2d.astype(compute_dtype)
    if t_pad != tokens:
        xq = jnp.pad(xq, ((0, t_pad - tokens), (0, 0)))

    grid = (t_pad // tm, f_pad // tf)
    cparams = pltpu.CompilerParams(
        dimension_semantics=("parallel", "arbitrary"),
        vmem_limit_bytes=vmem_limit_bytes)

    itemsize = jnp.dtype(compute_dtype).itemsize

    cost_a = pl.CostEstimate(
        flops=2 * t_pad * (hidden * r_pad + 2 * r_pad * f_pad),
        transcendentals=t_pad * f_pad,
        bytes_accessed=itemsize * (t_pad * hidden + hidden * r_pad
                                   + 2 * r_pad * f_pad + t_pad * r_pad))

    b = pl.pallas_call(
        _gate_silu_uplow_kernel,
        out_shape=jax.ShapeDtypeStruct((t_pad, r_pad), compute_dtype),
        grid_spec=pltpu.PrefetchScalarGridSpec(
            num_scalar_prefetch=0,
            grid=grid,
            in_specs=[
                pl.BlockSpec((tm, hidden), lambda i, j: (i, 0)),       # x row tile
                pl.BlockSpec((hidden, r_pad), lambda i, j: (0, 0)),    # Wg_lo (resident)
                pl.BlockSpec((r_pad, tf), lambda i, j: (0, j)),        # Wg_hi chunk
                pl.BlockSpec((tf, r_pad), lambda i, j: (j, 0)),        # Wu_lo chunk
            ],
            out_specs=pl.BlockSpec((tm, r_pad), lambda i, j: (i, 0)),
            scratch_shapes=[pltpu.VMEM((tm, r_pad), compute_dtype),    # a = x @ Wg_lo
                            pltpu.VMEM((tm, r_pad), jnp.float32)],     # f32 accumulator
        ),
        compiler_params=cparams,
        cost_estimate=cost_a,
    )(xq, g_lo, g_hi, u_lo)

    cost_b = pl.CostEstimate(
        flops=2 * t_pad * (2 * r_pad * f_pad + r_pad * hidden),
        transcendentals=0,
        bytes_accessed=itemsize * (t_pad * r_pad + 2 * r_pad * f_pad + r_pad * hidden)
                        + t_pad * hidden * x.dtype.itemsize)

    y = pl.pallas_call(
        _uphigh_down_kernel,
        out_shape=jax.ShapeDtypeStruct((t_pad, hidden), x.dtype),
        grid_spec=pltpu.PrefetchScalarGridSpec(
            num_scalar_prefetch=0,
            grid=grid,
            in_specs=[
                pl.BlockSpec((tm, r_pad), lambda i, j: (i, 0)),        # b row tile
                pl.BlockSpec((r_pad, tf), lambda i, j: (0, j)),        # Wu_hi chunk
                pl.BlockSpec((tf, r_pad), lambda i, j: (j, 0)),        # Wd_lo chunk
                pl.BlockSpec((r_pad, hidden), lambda i, j: (0, 0)),    # Wd_hi (resident)
            ],
            out_specs=pl.BlockSpec((tm, hidden), lambda i, j: (i, 0)),
            scratch_shapes=[pltpu.VMEM((tm, r_pad), jnp.float32)],     # f32 accumulator
        ),
        compiler_params=cparams,
        cost_estimate=cost_b,
    )(b, u_hi, d_lo, d_hi)

    y = y[:tokens]
    return y.reshape(orig_shape)


# --------------------------------------------------------------------------------------
# Synthetic params + plain-JAX reference (same bf16/f32 precision flow as the kernels)
# --------------------------------------------------------------------------------------
def init_params(key, hidden_size, intermediate_size, rank):
    ks = jax.random.split(key, 6)

    def w(k, shape):
        return (jax.random.normal(k, shape) / jnp.sqrt(shape[0])).astype(jnp.float32)

    return {
        # gate_proj: hidden -> rank -> intermediate
        "gate_low":  w(ks[0], (hidden_size, rank)),
        "gate_high": w(ks[1], (rank, intermediate_size)),
        # up_proj: intermediate -> rank -> intermediate
        "up_low":    w(ks[2], (intermediate_size, rank)),
        "up_high":   w(ks[3], (rank, intermediate_size)),
        # down_proj: intermediate -> rank -> hidden
        "down_low":  w(ks[4], (intermediate_size, rank)),
        "down_high": w(ks[5], (rank, hidden_size)),
    }


def reference_mlp(x, params, compute_dtype=jnp.bfloat16):
    p = {k: v.astype(compute_dtype) for k, v in params.items()}

    def mm(a, w):
        return jnp.dot(a.astype(compute_dtype), w, preferred_element_type=jnp.float32)

    a = mm(x, p["gate_low"])
    g = mm(a, p["gate_high"])
    s = g * jax.nn.sigmoid(g)
    b = mm(s, p["up_low"])
    u = mm(b, p["up_high"])
    c = mm(u, p["down_low"])
    y = mm(c, p["down_high"])
    return y.astype(x.dtype)


if __name__ == "__main__":
    # Small shapes consistent with the module's forward: x is [batch, seq, hidden].
    batch, seq = 2, 8
    hidden_size, intermediate_size = 128, 1024
    rank = 242  # matches the module-level `rank` in the PyTorch spec (padded to 256 inside)

    key = jax.random.PRNGKey(0)
    kx, kw = jax.random.split(key)
    x = jax.random.normal(kx, (batch, seq, hidden_size), dtype=jnp.float32)
    params = init_params(kw, hidden_size, intermediate_size, rank)

    mlp = jax.jit(lambda xx: llama_mlp_pallas(xx, params, row_tile=256, f_tile=512))
    out = mlp(x)
    jax.block_until_ready(out)

    ref = reference_mlp(x, params)
    max_err = float(jnp.max(jnp.abs(out - ref)))
    assert jnp.allclose(out, ref, atol=2e-2, rtol=2e-2), f"mismatch vs reference: {max_err}"

    print("KERNEL_OK")
</pallas_src>

<mosaic_0001>
module attributes {stable_mosaic.version = 11 : i64} {
  func.func @_gate_silu_uplow_kernel(%arg0: i32, %arg1: i32, %arg2: memref<16x128xbf16, #tpu.memory_space<vmem>>, %arg3: memref<128x256xbf16, #tpu.memory_space<vmem>>, %arg4: memref<256x512xbf16, #tpu.memory_space<vmem>>, %arg5: memref<512x256xbf16, #tpu.memory_space<vmem>>, %arg6: memref<16x256xbf16, #tpu.memory_space<vmem>>, %arg7: memref<16x256xbf16, #tpu.memory_space<vmem>>, %arg8: memref<16x256xf32, #tpu.memory_space<vmem>>) attributes {dimension_semantics = [#tpu.dimension_semantics<parallel>, #tpu.dimension_semantics<arbitrary>], iteration_bounds = array<i64: 1, 2>, scalar_prefetch = 0 : i64, scratch_operands = 2 : i64, tpu.core_type = #tpu.core_type<tc>, window_params = [{transform_indices = @transform_0, window_bounds = array<i64: 16, 128>}, {pipeline_mode = #tpu.pipeline_mode<synchronous>, transform_indices = @transform_1, window_bounds = array<i64: 128, 256>}, {transform_indices = @transform_2, window_bounds = array<i64: 256, 512>}, {transform_indices = @transform_3, window_bounds = array<i64: 512, 256>}, {transform_indices = @transform_4, window_bounds = array<i64: 16, 256>}]} {
    %c0_i32 = arith.constant 0 : i32
    %0 = arith.cmpi eq, %arg1, %c0_i32 : i32
    %1 = arith.extui %0 : i1 to i32
    %c0_i32_0 = arith.constant 0 : i32
    %2 = arith.cmpi ne, %1, %c0_i32_0 : i32
    scf.if %2 {
      %c0_13 = arith.constant 0 : index
      %c0_14 = arith.constant 0 : index
      %21 = vector.load %arg2[%c0_13, %c0_14] : memref<16x128xbf16, #tpu.memory_space<vmem>>, vector<16x128xbf16>
      %c0_15 = arith.constant 0 : index
      %c0_16 = arith.constant 0 : index
      %22 = vector.load %arg3[%c0_15, %c0_16] : memref<128x256xbf16, #tpu.memory_space<vmem>>, vector<128x256xbf16>
      %cst_17 = arith.constant dense<0.000000e+00> : vector<16x256xf32>
      %23 = tpu.matmul %21, %22, %cst_17 {dimension_numbers = #tpu.dot_dimension_numbers<[1], [0], [0], [1], [0, 0, 1, 1], [], []>} : vector<16x128xbf16>, vector<128x256xbf16>, vector<16x256xf32> -> vector<16x256xf32>
      %24 = arith.truncf %23 : vector<16x256xf32> to vector<16x256xbf16>
      %c0_18 = arith.constant 0 : index
      %c0_19 = arith.constant 0 : index
      %25 = vector.load %arg7[%c0_18, %c0_19] : memref<16x256xbf16, #tpu.memory_space<vmem>>, vector<16x256xbf16>
      tpu.vector_store %arg7[%c0_18, %c0_19], %24 {strides = array<i32>} : memref<16x256xbf16, #tpu.memory_space<vmem>>, vector<16x256xbf16>,
      %cst_20 = arith.constant 0.000000e+00 : f32
      %26 = vector.broadcast %cst_20 : f32 to vector<16x256xf32>
      %c0_21 = arith.constant 0 : index
      %c0_22 = arith.constant 0 : index
      %27 = vector.load %arg8[%c0_21, %c0_22] : memref<16x256xf32, #tpu.memory_space<vmem>>, vector<16x256xf32>
      tpu.vector_store %arg8[%c0_21, %c0_22], %26 {strides = array<i32>} : memref<16x256xf32, #tpu.memory_space<vmem>>, vector<16x256xf32>,
    } else {
    }
    %c0 = arith.constant 0 : index
    %c0_1 = arith.constant 0 : index
    %3 = vector.load %arg7[%c0, %c0_1] : memref<16x256xbf16, #tpu.memory_space<vmem>>, vector<16x256xbf16>
    %c0_2 = arith.constant 0 : index
    %c0_3 = arith.constant 0 : index
    %4 = vector.load %arg4[%c0_2, %c0_3] : memref<256x512xbf16, #tpu.memory_space<vmem>>, vector<256x512xbf16>
    %cst = arith.constant dense<0.000000e+00> : vector<16x512xf32>
    %5 = tpu.matmul %3, %4, %cst {dimension_numbers = #tpu.dot_dimension_numbers<[1], [0], [0], [1], [0, 0, 1, 1], [], []>} : vector<16x256xbf16>, vector<256x512xbf16>, vector<16x512xf32> -> vector<16x512xf32>
    %6 = arith.negf %5 : vector<16x512xf32>
    %7 = math.exp %6 : vector<16x512xf32>
    %cst_4 = arith.constant 1.000000e+00 : f32
    %8 = vector.broadcast %cst_4 : f32 to vector<16x512xf32>
    %9 = arith.addf %8, %7 : vector<16x512xf32>
    %10 = arith.divf %8, %9 : vector<16x512xf32>
    %11 = arith.mulf %5, %10 : vector<16x512xf32>
    %c0_5 = arith.constant 0 : index
    %c0_6 = arith.constant 0 : index
    %12 = vector.load %arg8[%c0_5, %c0_6] : memref<16x256xf32, #tpu.memory_space<vmem>>, vector<16x256xf32>
    %13 = arith.truncf %11 : vector<16x512xf32> to vector<16x512xbf16>
    %c0_7 = arith.constant 0 : index
    %c0_8 = arith.constant 0 : index
    %14 = vector.load %arg5[%c0_7, %c0_8] : memref<512x256xbf16, #tpu.memory_space<vmem>>, vector<512x256xbf16>
    %cst_9 = arith.constant dense<0.000000e+00> : vector<16x256xf32>
    %15 = tpu.matmul %13, %14, %cst_9 {dimension_numbers = #tpu.dot_dimension_numbers<[1], [0], [0], [1], [0, 0, 1, 1], [], []>} : vector<16x512xbf16>, vector<512x256xbf16>, vector<16x256xf32> -> vector<16x256xf32>
    %16 = arith.addf %12, %15 : vector<16x256xf32>
    %c0_10 = arith.constant 0 : index
    %c0_11 = arith.constant 0 : index
    %17 = vector.load %arg8[%c0_10, %c0_11] : memref<16x256xf32, #tpu.memory_space<vmem>>, vector<16x256xf32>
    tpu.vector_store %arg8[%c0_10, %c0_11], %16 {strides = array<i32>} : memref<16x256xf32, #tpu.memory_space<vmem>>, vector<16x256xf32>,
    %c1_i32 = arith.constant 1 : i32
    %18 = arith.cmpi eq, %arg1, %c1_i32 : i32
    %19 = arith.extui %18 : i1 to i32
    %c0_i32_12 = arith.constant 0 : i32
    %20 = arith.cmpi ne, %19, %c0_i32_12 : i32
    scf.if %20 {
      %c0_13 = arith.constant 0 : index
      %c0_14 = arith.constant 0 : index
      %21 = vector.load %arg8[%c0_13, %c0_14] : memref<16x256xf32, #tpu.memory_space<vmem>>, vector<16x256xf32>
      %22 = arith.truncf %21 : vector<16x256xf32> to vector<16x256xbf16>
      %c0_15 = arith.constant 0 : index
      %c0_16 = arith.constant 0 : index
      %23 = vector.load %arg6[%c0_15, %c0_16] : memref<16x256xbf16, #tpu.memory_space<vmem>>, vector<16x256xbf16>
      tpu.vector_store %arg6[%c0_15, %c0_16], %22 {strides = array<i32>} : memref<16x256xbf16, #tpu.memory_space<vmem>>, vector<16x256xbf16>,
    } else {
    }
    return
  }
  func.func @transform_0(%arg0: i32, %arg1: i32) -> (i32, i32) {
    %c0_i32 = arith.constant 0 : i32
    %c0_i32_0 = arith.constant 0 : i32
    return %arg0, %c0_i32 : i32, i32
  }
  func.func @transform_1(%arg0: i32, %arg1: i32) -> (i32, i32) {
    %c0_i32 = arith.constant 0 : i32
    %c0_i32_0 = arith.constant 0 : i32
    %c0_i32_1 = arith.constant 0 : i32
    return %c0_i32, %c0_i32_0 : i32, i32
  }
  func.func @transform_2(%arg0: i32, %arg1: i32) -> (i32, i32) {
    %c0_i32 = arith.constant 0 : i32
    %c0_i32_0 = arith.constant 0 : i32
    return %c0_i32, %arg1 : i32, i32
  }
  func.func @transform_3(%arg0: i32, %arg1: i32) -> (i32, i32) {
    %c0_i32 = arith.constant 0 : i32
    %c0_i32_0 = arith.constant 0 : i32
    return %arg1, %c0_i32 : i32, i32
  }
  func.func @transform_4(%arg0: i32, %arg1: i32) -> (i32, i32) {
    %c0_i32 = arith.constant 0 : i32
    %c0_i32_0 = arith.constant 0 : i32
    return %arg0, %c0_i32 : i32, i32
  }
}

module attributes {stable_mosaic.version = 11 : i64} {
  func.func @_uphigh_down_kernel(%arg0: i32, %arg1: i32, %arg2: memref<16x256xbf16, #tpu.memory_space<vmem>>, %arg3: memref<256x512xbf16, #tpu.memory_space<vmem>>, %arg4: memref<512x256xbf16, #tpu.memory_space<vmem>>, %arg5: memref<256x128xbf16, #tpu.memory_space<vmem>>, %arg6: memref<16x128xf32, #tpu.memory_space<vmem>>, %arg7: memref<16x256xf32, #tpu.memory_space<vmem>>) attributes {dimension_semantics = [#tpu.dimension_semantics<parallel>, #tpu.dimension_semantics<arbitrary>], iteration_bounds = array<i64: 1, 2>, scalar_prefetch = 0 : i64, scratch_operands = 1 : i64, tpu.core_type = #tpu.core_type<tc>, window_params = [{transform_indices = @transform_0, window_bounds = array<i64: 16, 256>}, {transform_indices = @transform_1, window_bounds = array<i64: 256, 512>}, {transform_indices = @transform_2, window_bounds = array<i64: 512, 256>}, {pipeline_mode = #tpu.pipeline_mode<synchronous>, transform_indices = @transform_3, window_bounds = array<i64: 256, 128>}, {transform_indices = @transform_4, window_bounds = array<i64: 16, 128>}]} {
    %c0_i32 = arith.constant 0 : i32
    %0 = arith.cmpi eq, %arg1, %c0_i32 : i32
    %1 = arith.extui %0 : i1 to i32
    %c0_i32_0 = arith.constant 0 : i32
    %2 = arith.cmpi ne, %1, %c0_i32_0 : i32
    scf.if %2 {
      %cst_12 = arith.constant 0.000000e+00 : f32
      %15 = vector.broadcast %cst_12 : f32 to vector<16x256xf32>
      %c0_13 = arith.constant 0 : index
      %c0_14 = arith.constant 0 : index
      %16 = vector.load %arg7[%c0_13, %c0_14] : memref<16x256xf32, #tpu.memory_space<vmem>>, vector<16x256xf32>
      tpu.vector_store %arg7[%c0_13, %c0_14], %15 {strides = array<i32>} : memref<16x256xf32, #tpu.memory_space<vmem>>, vector<16x256xf32>,
    } else {
    }
    %c0 = arith.constant 0 : index
    %c0_1 = arith.constant 0 : index
    %3 = vector.load %arg2[%c0, %c0_1] : memref<16x256xbf16, #tpu.memory_space<vmem>>, vector<16x256xbf16>
    %c0_2 = arith.constant 0 : index
    %c0_3 = arith.constant 0 : index
    %4 = vector.load %arg3[%c0_2, %c0_3] : memref<256x512xbf16, #tpu.memory_space<vmem>>, vector<256x512xbf16>
    %cst = arith.constant dense<0.000000e+00> : vector<16x512xf32>
    %5 = tpu.matmul %3, %4, %cst {dimension_numbers = #tpu.dot_dimension_numbers<[1], [0], [0], [1], [0, 0, 1, 1], [], []>} : vector<16x256xbf16>, vector<256x512xbf16>, vector<16x512xf32> -> vector<16x512xf32>
    %c0_4 = arith.constant 0 : index
    %c0_5 = arith.constant 0 : index
    %6 = vector.load %arg7[%c0_4, %c0_5] : memref<16x256xf32, #tpu.memory_space<vmem>>, vector<16x256xf32>
    %7 = arith.truncf %5 : vector<16x512xf32> to vector<16x512xbf16>
    %c0_6 = arith.constant 0 : index
    %c0_7 = arith.constant 0 : index
    %8 = vector.load %arg4[%c0_6, %c0_7] : memref<512x256xbf16, #tpu.memory_space<vmem>>, vector<512x256xbf16>
    %cst_8 = arith.constant dense<0.000000e+00> : vector<16x256xf32>
    %9 = tpu.matmul %7, %8, %cst_8 {dimension_numbers = #tpu.dot_dimension_numbers<[1], [0], [0], [1], [0, 0, 1, 1], [], []>} : vector<16x512xbf16>, vector<512x256xbf16>, vector<16x256xf32> -> vector<16x256xf32>
    %10 = arith.addf %6, %9 : vector<16x256xf32>
    %c0_9 = arith.constant 0 : index
    %c0_10 = arith.constant 0 : index
    %11 = vector.load %arg7[%c0_9, %c0_10] : memref<16x256xf32, #tpu.memory_space<vmem>>, vector<16x256xf32>
    tpu.vector_store %arg7[%c0_9, %c0_10], %10 {strides = array<i32>} : memref<16x256xf32, #tpu.memory_space<vmem>>, vector<16x256xf32>,
    %c1_i32 = arith.constant 1 : i32
    %12 = arith.cmpi eq, %arg1, %c1_i32 : i32
    %13 = arith.extui %12 : i1 to i32
    %c0_i32_11 = arith.constant 0 : i32
    %14 = arith.cmpi ne, %13, %c0_i32_11 : i32
    scf.if %14 {
      %c0_12 = arith.constant 0 : index
      %c0_13 = arith.constant 0 : index
      %15 = vector.load %arg7[%c0_12, %c0_13] : memref<16x256xf32, #tpu.memory_space<vmem>>, vector<16x256xf32>
      %16 = arith.truncf %15 : vector<16x256xf32> to vector<16x256xbf16>
      %c0_14 = arith.constant 0 : index
      %c0_15 = arith.constant 0 : index
      %17 = vector.load %arg5[%c0_14, %c0_15] : memref<256x128xbf16, #tpu.memory_space<vmem>>, vector<256x128xbf16>
      %cst_16 = arith.constant dense<0.000000e+00> : vector<16x128xf32>
      %18 = tpu.matmul %16, %17, %cst_16 {dimension_numbers = #tpu.dot_dimension_numbers<[1], [0], [0], [1], [0, 0, 1, 1], [], []>} : vector<16x256xbf16>, vector<256x128xbf16>, vector<16x128xf32> -> vector<16x128xf32>
      %c0_17 = arith.constant 0 : index
      %c0_18 = arith.constant 0 : index
      %19 = vector.load %arg6[%c0_17, %c0_18] : memref<16x128xf32, #tpu.memory_space<vmem>>, vector<16x128xf32>
      tpu.vector_store %arg6[%c0_17, %c0_18], %18 {strides = array<i32>} : memref<16x128xf32, #tpu.memory_space<vmem>>, vector<16x128xf32>,
    } else {
    }
    return
  }
  func.func @transform_0(%arg0: i32, %arg1: i32) -> (i32, i32) {
    %c0_i32 = arith.constant 0 : i32
    %c0_i32_0 = arith.constant 0 : i32
    return %arg0, %c0_i32 : i32, i32
  }
  func.func @transform_1(%arg0: i32, %arg1: i32) -> (i32, i32) {
    %c0_i32 = arith.constant 0 : i32
    %c0_i32_0 = arith.constant 0 : i32
    return %c0_i32, %arg1 : i32, i32
  }
  func.func @transform_2(%arg0: i32, %arg1: i32) -> (i32, i32) {
    %c0_i32 = arith.constant 0 : i32
    %c0_i32_0 = arith.constant 0 : i32
    return %arg1, %c0_i32 : i32, i32
  }
  func.func @transform_3(%arg0: i32, %arg1: i32) -> (i32, i32) {
    %c0_i32 = arith.constant 0 : i32
    %c0_i32_0 = arith.constant 0 : i32
    %c0_i32_1 = arith.constant 0 : i32
    return %c0_i32, %c0_i32_0 : i32, i32
  }
  func.func @transform_4(%arg0: i32, %arg1: i32) -> (i32, i32) {
    %c0_i32 = arith.constant 0 : i32
    %c0_i32_0 = arith.constant 0 : i32
    return %arg0, %c0_i32 : i32, i32
  }
}

</mosaic_0001>

<bundles_post_ra>
// kernel: _lambda_.3
= control target key start
LH: loop header
LB: loop body
LE: loop exit
PB: predicated region body
PF: predicated region fallthrough
CT: control target
= control target key end

     0   :  { %9 = vsyncpa [#allocation5], 0  ;;  %s2204_s15 = smov 0   ;;  %s2206_s16 = smov 0   ;;  %s2626_s0 = inlined_call_operand.vmem [shape: bf16[16,256], index: 0, kind: input, shape index: {}]   ;;  %s2627_s1 = inlined_call_operand.vmem [shape: bf16[256,1024], index: 1, kind: input, shape index: {}]   ;;  %s2628_s2 = inlined_call_operand.vmem [shape: bf16[1024,256], index: 2, kind: input, shape index: {}]   ;;  %s2629_s3 = inlined_call_operand.vmem [shape: bf16[256,128], index: 3, kind: input, shape index: {}]   ;;  %s2630_s4 = inlined_call_operand.hbm [shape: f32[16,128], index: 4, kind: output, shape index: {}]  }
   0x1   :  { %s2208_s17 = smov 0   ;;  %s2210_s18 = smov 0  }
   0x2   :  { %s2212_s19 = smov 0  }
   0x3 LB: > { %s1652_s20 = sadd.s32 4294967295, %s2173_s19   ;;  %s24_s21 = sadd.s32 1, %s2169_s18  ;;  %s2173_s19 = sphi %s2212_s19, %s15_s19   ;;  %s2169_s18 = sphi %s2210_s18, %s2635_s18   ;;  %s2165_s17 = sphi %s2208_s17, %s2634_s17   ;;  %s2161_s16 = sphi %s2206_s16, %s2633_s16   ;;  %s2157_s15 = sphi %s2204_s15, %s2632_s15  }
   0x4   : > { %p25_p0 = scmp.ge.s32.totalorder %s24_s21, 2  ;;  %p67_p1 = scmp.ne.s32.totalorder %s2161_s16, %s2157_s15 }
   0x5   : > { %p68_p2 = scmp.eq.s32.totalorder %s2173_s19, 0  ;;  %s60_s23 = sadd.s32 1, %s2161_s16 }
   0x6   : > { %s2637_s21 = smov (%p25_p0, %s24_s21), 0  ;;  %p1655_p5 = scmp.ge.s32.totalorder %s2173_s19, 2 }
   0x7   : > { %p69_p3 = por %p68_p2, %p67_p1  ;;  %s57_s22 = ssub.s32 %s2169_s18, %s2637_s21 }
   0x8   : > { %p58_p4 = scmp.eq.s32.totalorder %s57_s22, 0  ;;  %179 = sbr.rel (%p1655_p5) target bundleno = 51 (0x33), region = 24 }
   0xa   : > { %s2240_s24 = scalar_select %p58_p4, %s2161_s16, %s60_s23  }
   0xf   : > { %182 = sbr.rel (!%p69_p3) target bundleno = 51 (0x33), region = 28  ;;  %s184_s25 = sand.u32 (%p69_p3), 1, %s2161_s16  }
  0x10   : > { %s1816_s26 = sshll.u32 (%p69_p3), %s2169_s18, 4  ;;  %s1656_s27 = sshll.u32 (%p69_p3), %s184_s25, 9 }
  0x11   : > { %s2248_s30 = scalar_lea.vmem (%p69_p3), %s2627_s1, %s1816_s26  ;;  %s2253_s5 = scalar_lea.vmem (%p69_p3), [#allocation3], %s1656_s27 }
  0x12   : > { %v202_v0 = vld [vmem:[%s2248_s30] sm:$0xff] (%p69_p3)  ;;  %v204_v1 = vld [vmem:[%s2248_s30 + $0x8] sm:$0xff] (%p69_p3) }
  0x13   : > { %v206_v2 = vld [vmem:[%s2248_s30 + $0x20] sm:$0xff] (%p69_p3)  ;;  %203 = vst [vmem:[%s2253_s5] sm:$0xff] (%p69_p3), %v202_v0  ;;  %205 = vst [vmem:[%s2253_s5 + $0x8] sm:$0xff] (%p69_p3), %v204_v1  ;;  %v208_v3 = vld [vmem:[%s2248_s30 + $0x28] sm:$0xff] (%p69_p3) }
  0x14   : > { %207 = vst [vmem:[%s2253_s5 + $0x10] sm:$0xff] (%p69_p3), %v206_v2  ;;  %v210_v4 = vld [vmem:[%s2248_s30 + $0x40] sm:$0xff] (%p69_p3)  ;;  %v212_v5 = vld [vmem:[%s2248_s30 + $0x48] sm:$0xff] (%p69_p3)  ;;  %209 = vst [vmem:[%s2253_s5 + $0x18] sm:$0xff] (%p69_p3), %v208_v3 }
  0x15   : > { %211 = vst [vmem:[%s2253_s5 + $0x20] sm:$0xff] (%p69_p3), %v210_v4  ;;  %213 = vst [vmem:[%s2253_s5 + $0x28] sm:$0xff] (%p69_p3), %v212_v5  ;;  %v214_v6 = vld [vmem:[%s2248_s30 + $0x60] sm:$0xff] (%p69_p3)  ;;  %v216_v7 = vld [vmem:[%s2248_s30 + $0x68] sm:$0xff] (%p69_p3) }
  0x16   : > { %v218_v8 = vld [vmem:[%s2248_s30 + $0x80] sm:$0xff]  ;;  %215 = vst [vmem:[%s2253_s5 + $0x30] sm:$0xff] %v214_v6  ;;  %217 = vst [vmem:[%s2253_s5 + $0x38] sm:$0xff] %v216_v7  ;;  %v220_v9 = vld [vmem:[%s2248_s30 + $0x88] sm:$0xff] }
  0x17   : > { %219 = vst [vmem:[%s2253_s5 + $0x40] sm:$0xff] %v218_v8  ;;  %v222_v10 = vld [vmem:[%s2248_s30 + $0xa0] sm:$0xff]  ;;  %v224_v11 = vld [vmem:[%s2248_s30 + $0xa8] sm:$0xff]  ;;  %221 = vst [vmem:[%s2253_s5 + $0x48] sm:$0xff] %v220_v9 }
  0x18   : > { %223 = vst [vmem:[%s2253_s5 + $0x50] sm:$0xff] %v222_v10  ;;  %225 = vst [vmem:[%s2253_s5 + $0x58] sm:$0xff] %v224_v11  ;;  %v226_v12 = vld [vmem:[%s2248_s30 + $0xc0] sm:$0xff]  ;;  %v228_v13 = vld [vmem:[%s2248_s30 + $0xc8] sm:$0xff] }
  0x19   : > { %v230_v14 = vld [vmem:[%s2248_s30 + $0xe0] sm:$0xff]  ;;  %227 = vst [vmem:[%s2253_s5 + $0x60] sm:$0xff] %v226_v12  ;;  %229 = vst [vmem:[%s2253_s5 + $0x68] sm:$0xff] %v228_v13  ;;  %v232_v15 = vld [vmem:[%s2248_s30 + $0xe8] sm:$0xff] }
  0x1a   : > { %231 = vst [vmem:[%s2253_s5 + $0x70] sm:$0xff] %v230_v14  ;;  %v234_v16 = vld [vmem:[%s2248_s30 + $0x100] sm:$0xff]  ;;  %v236_v17 = vld [vmem:[%s2248_s30 + $0x108] sm:$0xff]  ;;  %233 = vst [vmem:[%s2253_s5 + $0x78] sm:$0xff] %v232_v15 }
  0x1b   : > { %235 = vst [vmem:[%s2253_s5 + $0x80] sm:$0xff] %v234_v16  ;;  %237 = vst [vmem:[%s2253_s5 + $0x88] sm:$0xff] %v236_v17  ;;  %v238_v18 = vld [vmem:[%s2248_s30 + $0x120] sm:$0xff]  ;;  %v240_v19 = vld [vmem:[%s2248_s30 + $0x128] sm:$0xff] }
  0x1c   : > { %v242_v20 = vld [vmem:[%s2248_s30 + $0x140] sm:$0xff]  ;;  %239 = vst [vmem:[%s2253_s5 + $0x90] sm:$0xff] %v238_v18  ;;  %241 = vst [vmem:[%s2253_s5 + $0x98] sm:$0xff] %v240_v19  ;;  %v244_v21 = vld [vmem:[%s2248_s30 + $0x148] sm:$0xff] }
  0x1d   : > { %243 = vst [vmem:[%s2253_s5 + $0xa0] sm:$0xff] %v242_v20  ;;  %v246_v22 = vld [vmem:[%s2248_s30 + $0x160] sm:$0xff]  ;;  %v248_v23 = vld [vmem:[%s2248_s30 + $0x168] sm:$0xff]  ;;  %245 = vst [vmem:[%s2253_s5 + $0xa8] sm:$0xff] %v244_v21 }
  0x1e   : > { %247 = vst [vmem:[%s2253_s5 + $0xb0] sm:$0xff] %v246_v22  ;;  %249 = vst [vmem:[%s2253_s5 + $0xb8] sm:$0xff] %v248_v23  ;;  %v250_v24 = vld [vmem:[%s2248_s30 + $0x180] sm:$0xff]  ;;  %v252_v25 = vld [vmem:[%s2248_s30 + $0x188] sm:$0xff] }
  0x1f   : > { %v254_v26 = vld [vmem:[%s2248_s30 + $0x1a0] sm:$0xff]  ;;  %251 = vst [vmem:[%s2253_s5 + $0xc0] sm:$0xff] %v250_v24  ;;  %253 = vst [vmem:[%s2253_s5 + $0xc8] sm:$0xff] %v252_v25  ;;  %v256_v27 = vld [vmem:[%s2248_s30 + $0x1a8] sm:$0xff] }
  0x20   : > { %255 = vst [vmem:[%s2253_s5 + $0xd0] sm:$0xff] %v254_v26  ;;  %v258_v28 = vld [vmem:[%s2248_s30 + $0x1c0] sm:$0xff]  ;;  %v260_v29 = vld [vmem:[%s2248_s30 + $0x1c8] sm:$0xff]  ;;  %257 = vst [vmem:[%s2253_s5 + $0xd8] sm:$0xff] %v256_v27 }
  0x21   : > { %259 = vst [vmem:[%s2253_s5 + $0xe0] sm:$0xff] %v258_v28  ;;  %261 = vst [vmem:[%s2253_s5 + $0xe8] sm:$0xff] %v260_v29  ;;  %v262_v30 = vld [vmem:[%s2248_s30 + $0x1e0] sm:$0xff]  ;;  %v264_v31 = vld [vmem:[%s2248_s30 + $0x1e8] sm:$0xff] }
  0x22   : > { %v266_v32 = vld [vmem:[%s2248_s30 + $0x200] sm:$0xff]  ;;  %263 = vst [vmem:[%s2253_s5 + $0xf0] sm:$0xff] %v262_v30  ;;  %265 = vst [vmem:[%s2253_s5 + $0xf8] sm:$0xff] %v264_v31  ;;  %v268_v33 = vld [vmem:[%s2248_s30 + $0x208] sm:$0xff] }
  0x23   : > { %267 = vst [vmem:[%s2253_s5 + $0x100] sm:$0xff] %v266_v32  ;;  %v270_v34 = vld [vmem:[%s2248_s30 + $0x220] sm:$0xff]  ;;  %v272_v35 = vld [vmem:[%s2248_s30 + $0x228] sm:$0xff]  ;;  %269 = vst [vmem:[%s2253_s5 + $0x108] sm:$0xff] %v268_v33 }
  0x24   : > { %271 = vst [vmem:[%s2253_s5 + $0x110] sm:$0xff] %v270_v34  ;;  %273 = vst [vmem:[%s2253_s5 + $0x118] sm:$0xff] %v272_v35  ;;  %v274_v36 = vld [vmem:[%s2248_s30 + $0x240] sm:$0xff]  ;;  %v276_v37 = vld [vmem:[%s2248_s30 + $0x248] sm:$0xff] }
  0x25   : > { %v278_v38 = vld [vmem:[%s2248_s30 + $0x260] sm:$0xff]  ;;  %275 = vst [vmem:[%s2253_s5 + $0x120] sm:$0xff] %v274_v36  ;;  %277 = vst [vmem:[%s2253_s5 + $0x128] sm:$0xff] %v276_v37  ;;  %v280_v39 = vld [vmem:[%s2248_s30 + $0x268] sm:$0xff] }
  0x26   : > { %279 = vst [vmem:[%s2253_s5 + $0x130] sm:$0xff] %v278_v38  ;;  %v282_v40 = vld [vmem:[%s2248_s30 + $0x280] sm:$0xff]  ;;  %v284_v41 = vld [vmem:[%s2248_s30 + $0x288] sm:$0xff]  ;;  %281 = vst [vmem:[%s2253_s5 + $0x138] sm:$0xff] %v280_v39 }
  0x27   : > { %283 = vst [vmem:[%s2253_s5 + $0x140] sm:$0xff] %v282_v40  ;;  %285 = vst [vmem:[%s2253_s5 + $0x148] sm:$0xff] %v284_v41  ;;  %v286_v42 = vld [vmem:[%s2248_s30 + $0x2a0] sm:$0xff]  ;;  %v288_v43 = vld [vmem:[%s2248_s30 + $0x2a8] sm:$0xff] }
  0x28   : > { %v290_v44 = vld [vmem:[%s2248_s30 + $0x2c0] sm:$0xff]  ;;  %287 = vst [vmem:[%s2253_s5 + $0x150] sm:$0xff] %v286_v42  ;;  %289 = vst [vmem:[%s2253_s5 + $0x158] sm:$0xff] %v288_v43  ;;  %v292_v45 = vld [vmem:[%s2248_s30 + $0x2c8] sm:$0xff] }
  0x29   : > { %291 = vst [vmem:[%s2253_s5 + $0x160] sm:$0xff] %v290_v44  ;;  %v294_v46 = vld [vmem:[%s2248_s30 + $0x2e0] sm:$0xff]  ;;  %v296_v47 = vld [vmem:[%s2248_s30 + $0x2e8] sm:$0xff]  ;;  %293 = vst [vmem:[%s2253_s5 + $0x168] sm:$0xff] %v292_v45 }
  0x2a   : > { %295 = vst [vmem:[%s2253_s5 + $0x170] sm:$0xff] %v294_v46  ;;  %297 = vst [vmem:[%s2253_s5 + $0x178] sm:$0xff] %v296_v47  ;;  %v298_v48 = vld [vmem:[%s2248_s30 + $0x300] sm:$0xff]  ;;  %v300_v49 = vld [vmem:[%s2248_s30 + $0x308] sm:$0xff] }
  0x2b   : > { %v302_v50 = vld [vmem:[%s2248_s30 + $0x320] sm:$0xff]  ;;  %299 = vst [vmem:[%s2253_s5 + $0x180] sm:$0xff] %v298_v48  ;;  %301 = vst [vmem:[%s2253_s5 + $0x188] sm:$0xff] %v300_v49  ;;  %v304_v51 = vld [vmem:[%s2248_s30 + $0x328] sm:$0xff] }
  0x2c   : > { %303 = vst [vmem:[%s2253_s5 + $0x190] sm:$0xff] %v302_v50  ;;  %v306_v52 = vld [vmem:[%s2248_s30 + $0x340] sm:$0xff]  ;;  %v308_v53 = vld [vmem:[%s2248_s30 + $0x348] sm:$0xff]  ;;  %305 = vst [vmem:[%s2253_s5 + $0x198] sm:$0xff] %v304_v51 }
  0x2d   : > { %307 = vst [vmem:[%s2253_s5 + $0x1a0] sm:$0xff] %v306_v52  ;;  %309 = vst [vmem:[%s2253_s5 + $0x1a8] sm:$0xff] %v308_v53  ;;  %v310_v54 = vld [vmem:[%s2248_s30 + $0x360] sm:$0xff]  ;;  %v312_v55 = vld [vmem:[%s2248_s30 + $0x368] sm:$0xff] }
  0x2e   : > { %v314_v56 = vld [vmem:[%s2248_s30 + $0x380] sm:$0xff]  ;;  %311 = vst [vmem:[%s2253_s5 + $0x1b0] sm:$0xff] %v310_v54  ;;  %313 = vst [vmem:[%s2253_s5 + $0x1b8] sm:$0xff] %v312_v55  ;;  %v316_v57 = vld [vmem:[%s2248_s30 + $0x388] sm:$0xff] }
  0x2f   : > { %315 = vst [vmem:[%s2253_s5 + $0x1c0] sm:$0xff] %v314_v56  ;;  %v318_v58 = vld [vmem:[%s2248_s30 + $0x3a0] sm:$0xff]  ;;  %v320_v59 = vld [vmem:[%s2248_s30 + $0x3a8] sm:$0xff]  ;;  %317 = vst [vmem:[%s2253_s5 + $0x1c8] sm:$0xff] %v316_v57 }
  0x30   : > { %319 = vst [vmem:[%s2253_s5 + $0x1d0] sm:$0xff] %v318_v58  ;;  %321 = vst [vmem:[%s2253_s5 + $0x1d8] sm:$0xff] %v320_v59  ;;  %v322_v60 = vld [vmem:[%s2248_s30 + $0x3c0] sm:$0xff]  ;;  %v324_v61 = vld [vmem:[%s2248_s30 + $0x3c8] sm:$0xff] }
  0x31   : > { %v326_v62 = vld [vmem:[%s2248_s30 + $0x3e0] sm:$0xff]  ;;  %323 = vst [vmem:[%s2253_s5 + $0x1e0] sm:$0xff] %v322_v60  ;;  %325 = vst [vmem:[%s2253_s5 + $0x1e8] sm:$0xff] %v324_v61  ;;  %v328_v63 = vld [vmem:[%s2248_s30 + $0x3e8] sm:$0xff] }
  0x32   : > { %327 = vst [vmem:[%s2253_s5 + $0x1f0] sm:$0xff] %v326_v62  ;;  %329 = vst [vmem:[%s2253_s5 + $0x1f8] sm:$0xff] %v328_v63 }
  0x33 PF: > { %p1659_p6 = scmp.ge.s32.totalorder %s2173_s19, 1  ;;  %p344_p7 = scmp.lt.s32.totalorder %s2173_s19, 3 }
  0x35   : > { %p345_p8 = pnand %p1659_p6, %p344_p7 }
  0x36   : > { %s351_s6 = sand.u32 (!%p345_p8), 1, %s2157_s15   ;;  %s1661_s7 = sshll.u32 (!%p345_p8), %s2165_s17, 6 }
  0x37   : > { %348 = sbr.rel (%p345_p8) target bundleno = 888 (0x378), region = 55  ;;  %s1660_s8 = sshll.u32 (!%p345_p8), %s351_s6, 9 }
  0x38   : > { %p392_p9 = scmp.lt.s32.totalorder (!%p345_p8), %s1661_s7, 127  ;;  %s2389_s13 = scalar_lea.vmem (!%p345_p8), [#allocation3], %s1660_s8 }
  0x39   : > { %p1664_p10 = scmp.ne.s32.totalorder (!%p345_p8), %s2165_s17, 0 }
  0x3e   : > { %s2639_s7 = smov (!%p392_p9, %s1661_s7), 127  ;;  %403 = sbr.rel (%p1664_p10) target bundleno = 69 (0x45), region = 63 }
  0x3f   : > { %s1817_s9 = sshll.u32 %s2639_s7, 3  ;;  %v2175_v0 = vmov (!%p1664_p10), 0.0  }
  0x40   : > { %s2387_s12 = scalar_lea.vmem %s2628_s2, %s1817_s9  ;;  %404 = vst [vmem:[#allocation2] sm:$0xff] (!%p1664_p10), %v2175_v0  ;;  %405 = vst [vmem:[#allocation2 + $0x8] sm:$0xff] (!%p1664_p10), %v2175_v0 }
  0x41   : > { %406 = vst [vmem:[#allocation2 + $0x10] sm:$0xff] (!%p1664_p10), %v2175_v0  ;;  %407 = vst [vmem:[#allocation2 + $0x18] sm:$0xff] (!%p1664_p10), %v2175_v0 }
  0x45 PF: > { %v1894_v1 = vld [vmem:[%s2389_s13 + $0x4] ss:$16 sps:$4 sm:$0xff]   ;;  %v1896_v2 = vld [vmem:[%s2389_s13] ss:$16 sps:$4 sm:$0xff]   ;;  %v1947_v43 = vld [vmem:[%s2389_s13 + $0xc] ss:$16 sps:$4 sm:$0xff]  }
  0x46   : > { %804 = vmatprep.subr.bf16.mxu1 %v1894_v1  ;;  %v1897_v3 = vld [vmem:[%s2389_s13 + $0x24] ss:$16 sps:$4 sm:$0xff]   ;;  %v1899_v4 = vld [vmem:[%s2389_s13 + $0x20] ss:$16 sps:$4 sm:$0xff]   ;;  %v1945_v47 = vld [vmem:[%s2389_s13 + $0x8] ss:$16 sps:$4 sm:$0xff]  }
  0x47   : > { %805 = vmatpush1.bf16.msra.mxu1 %v1896_v2  ;;  %v1900_v5 = vld [vmem:[%s2389_s13 + $0x44] ss:$16 sps:$4 sm:$0xff]   ;;  %v1902_v6 = vld [vmem:[%s2389_s13 + $0x40] ss:$16 sps:$4 sm:$0xff]   ;;  %v1950_v48 = vld [vmem:[%s2389_s13 + $0x2c] ss:$16 sps:$4 sm:$0xff]  }
  0x48   : > { %806 = vmatprep.subr.bf16.mxu1 %v1897_v3  ;;  %v1903_v7 = vld [vmem:[%s2389_s13 + $0x64] ss:$16 sps:$4 sm:$0xff]   ;;  %v1905_v8 = vld [vmem:[%s2389_s13 + $0x60] ss:$16 sps:$4 sm:$0xff]   ;;  %v1948_v51 = vld [vmem:[%s2389_s13 + $0x28] ss:$16 sps:$4 sm:$0xff]  }
  0x49   : > { %v1906_v9 = vld [vmem:[%s2389_s13 + $0x84] ss:$16 sps:$4 sm:$0xff]   ;;  %v1908_v10 = vld [vmem:[%s2389_s13 + $0x80] ss:$16 sps:$4 sm:$0xff]   ;;  %v1953_v52 = vld [vmem:[%s2389_s13 + $0x4c] ss:$16 sps:$4 sm:$0xff]  }
  0x4a   : > { %v1909_v11 = vld [vmem:[%s2389_s13 + $0xa4] ss:$16 sps:$4 sm:$0xff]   ;;  %v1911_v12 = vld [vmem:[%s2389_s13 + $0xa0] ss:$16 sps:$4 sm:$0xff]   ;;  %v1951_v55 = vld [vmem:[%s2389_s13 + $0x48] ss:$16 sps:$4 sm:$0xff]  }
  0x4b   : > { %807 = vmatpush1.bf16.msra.mxu1 %v1899_v4  ;;  %v1912_v13 = vld [vmem:[%s2389_s13 + $0xc4] ss:$16 sps:$4 sm:$0xff]   ;;  %v1914_v15 = vld [vmem:[%s2389_s13 + $0xc0] ss:$16 sps:$4 sm:$0xff]   ;;  %v1956_v56 = vld [vmem:[%s2389_s13 + $0x6c] ss:$16 sps:$4 sm:$0xff]  }
  0x4c   : > { %808 = vmatprep.subr.bf16.mxu1 %v1900_v5  ;;  %v2408_v14 = vld [vmem:[%s2626_s0 + $0x4] ss:$8 sps:$4 sm:$0xff]   ;;  %v1917_v17 = vld [vmem:[%s2389_s13 + $0xe0] ss:$16 sps:$4 sm:$0xff]   ;;  %v1996_v30 = vld [vmem:[%s2387_s12 + $0x14] ss:$8 sps:$4 sm:$0xff]  }
  0x4d   : > { %v1915_v16 = vld [vmem:[%s2389_s13 + $0xe4] ss:$16 sps:$4 sm:$0xff]   ;;  %836 = vmatprep.mubr.bf16.mxu1 %v2408_v14  ;;  %v1920_v19 = vld [vmem:[%s2389_s13 + $0x100] ss:$16 sps:$4 sm:$0xff]   ;;  %v1954_v59 = vld [vmem:[%s2389_s13 + $0x68] ss:$16 sps:$4 sm:$0xff]  }
  0x4e   : > { %v1918_v18 = vld [vmem:[%s2389_s13 + $0x104] ss:$16 sps:$4 sm:$0xff]   ;;  %v1923_v21 = vld [vmem:[%s2389_s13 + $0x120] ss:$16 sps:$4 sm:$0xff]   ;;  %v1959_v60 = vld [vmem:[%s2389_s13 + $0x8c] ss:$16 sps:$4 sm:$0xff]  }
  0x4f   : > { %809 = vmatpush1.bf16.msra.mxu1 %v1902_v6  ;;  %v1921_v20 = vld [vmem:[%s2389_s13 + $0x124] ss:$16 sps:$4 sm:$0xff]   ;;  %v1926_v23 = vld [vmem:[%s2389_s13 + $0x140] ss:$16 sps:$4 sm:$0xff]   ;;  %v1957_v63 = vld [vmem:[%s2389_s13 + $0x88] ss:$16 sps:$4 sm:$0xff]  }
  0x50   : > { %810 = vmatprep.subr.bf16.mxu1 %v1903_v7  ;;  %v1924_v22 = vld [vmem:[%s2389_s13 + $0x144] ss:$16 sps:$4 sm:$0xff]   ;;  %v1929_v25 = vld [vmem:[%s2389_s13 + $0x160] ss:$16 sps:$4 sm:$0xff]   ;;  %v1962_v0 = vld [vmem:[%s2389_s13 + $0xac] ss:$16 sps:$4 sm:$0xff]  }
  0x51   : > { %v1927_v24 = vld [vmem:[%s2389_s13 + $0x164] ss:$16 sps:$4 sm:$0xff]   ;;  %v1995_v28 = vld [vmem:[%s2387_s12] ss:$8 sps:$4 sm:$0xff]   ;;  %v1998_v32 = vld [vmem:[%s2387_s12 + $0x10] ss:$8 sps:$4 sm:$0xff]  }
  0x52   : > { %v1930_v26 = vld [vmem:[%s2389_s13 + $0x184] ss:$16 sps:$4 sm:$0xff]   ;;  %v1932_v29 = vld [vmem:[%s2389_s13 + $0x180] ss:$16 sps:$4 sm:$0xff]   ;;  %v1960_v3 = vld [vmem:[%s2389_s13 + $0xa8] ss:$16 sps:$4 sm:$0xff]  }
  0x53   : > { %811 = vmatpush1.bf16.msra.mxu1 %v1905_v8  ;;  %v1993_v27 = vld [vmem:[%s2387_s12 + $0x4] ss:$8 sps:$4 sm:$0xff]   ;;  %v1935_v34 = vld [vmem:[%s2389_s13 + $0x1a0] ss:$16 sps:$4 sm:$0xff]   ;;  %v2002_v37 = vld [vmem:[%s2387_s12 + $0x34] ss:$8 sps:$4 sm:$0xff]  }
  0x54   : > { %812 = vmatprep.subr.bf16.mxu1 %v1906_v9  ;;  %1282 = vmatprep.subr.bf16.mxu0 %v1993_v27  ;;  %v1933_v31 = vld [vmem:[%s2389_s13 + $0x1a4] ss:$16 sps:$4 sm:$0xff]   ;;  %v2001_v36 = vld [vmem:[%s2387_s12 + $0x20] ss:$8 sps:$4 sm:$0xff]   ;;  %v2004_v40 = vld [vmem:[%s2387_s12 + $0x30] ss:$8 sps:$4 sm:$0xff]  }
  0x55   : > { %1283 = vmatpush1.bf16.msra.mxu0 %v1995_v28  ;;  %v1999_v33 = vld [vmem:[%s2387_s12 + $0x24] ss:$8 sps:$4 sm:$0xff]   ;;  %v1938_v38 = vld [vmem:[%s2389_s13 + $0x1c0] ss:$16 sps:$4 sm:$0xff]   ;;  %v2008_v46 = vld [vmem:[%s2387_s12 + $0x54] ss:$8 sps:$4 sm:$0xff]  }
  0x56   : > { %1284 = vmatprep.subr.bf16.mxu0 %v1996_v30  ;;  %v1936_v35 = vld [vmem:[%s2389_s13 + $0x1c4] ss:$16 sps:$4 sm:$0xff]   ;;  %v1941_v42 = vld [vmem:[%s2389_s13 + $0x1e0] ss:$16 sps:$4 sm:$0xff]   ;;  %v1965_v4 = vld [vmem:[%s2389_s13 + $0xcc] ss:$16 sps:$4 sm:$0xff]  }
  0x57   : > { %813 = vmatpush1.bf16.msra.mxu1 %v1908_v10  ;;  %v1939_v39 = vld [vmem:[%s2389_s13 + $0x1e4] ss:$16 sps:$4 sm:$0xff]   ;;  %v2007_v44 = vld [vmem:[%s2387_s12 + $0x40] ss:$8 sps:$4 sm:$0xff]   ;;  %v2010_v49 = vld [vmem:[%s2387_s12 + $0x50] ss:$8 sps:$4 sm:$0xff]  }
  0x58   : > { %814 = vmatprep.subr.bf16.mxu1 %v1909_v11  ;;  %v2005_v41 = vld [vmem:[%s2387_s12 + $0x44] ss:$8 sps:$4 sm:$0xff]   ;;  %v2444_v45 = vld [vmem:[%s2626_s0] ss:$8 sps:$4 sm:$0xff]   ;;  %v2014_v54 = vld [vmem:[%s2387_s12 + $0x74] ss:$8 sps:$4 sm:$0xff]  }
  0x59   : > { %1285 = vmatpush1.bf16.msra.mxu0 %v1998_v32  ;;  %v2011_v50 = vld [vmem:[%s2387_s12 + $0x64] ss:$8 sps:$4 sm:$0xff]   ;;  %v2013_v53 = vld [vmem:[%s2387_s12 + $0x60] ss:$8 sps:$4 sm:$0xff]   ;;  %v2016_v57 = vld [vmem:[%s2387_s12 + $0x70] ss:$8 sps:$4 sm:$0xff]  }
  0x5a   : > { %1286 = vmatprep.subr.bf16.mxu0 %v1999_v33  ;;  %v2017_v58 = vld [vmem:[%s2387_s12 + $0x84] ss:$8 sps:$4 sm:$0xff]   ;;  %v2019_v61 = vld [vmem:[%s2387_s12 + $0x80] ss:$8 sps:$4 sm:$0xff]   ;;  %v2020_v62 = vld [vmem:[%s2387_s12 + $0x94] ss:$8 sps:$4 sm:$0xff]  }
  0x5b   : > { %815 = vmatpush1.bf16.msra.mxu1 %v1911_v12  ;;  %v2022_v1 = vld [vmem:[%s2387_s12 + $0x90] ss:$8 sps:$4 sm:$0xff]   ;;  %v2023_v2 = vld [vmem:[%s2387_s12 + $0xa4] ss:$8 sps:$4 sm:$0xff]   ;;  %v2025_v5 = vld [vmem:[%s2387_s12 + $0xa0] ss:$8 sps:$4 sm:$0xff]  }
  0x5c   : > { %816 = vmatprep.subr.bf16.mxu1 %v1912_v13  ;;  %v2026_v6 = vld [vmem:[%s2387_s12 + $0xb4] ss:$8 sps:$4 sm:$0xff]   ;;  %v1963_v7 = vld [vmem:[%s2389_s13 + $0xc8] ss:$16 sps:$4 sm:$0xff]   ;;  %v2029_v10 = vld [vmem:[%s2387_s12 + $0xc4] ss:$8 sps:$4 sm:$0xff]  }
  0x5d   : > { %1287 = vmatpush1.bf16.msra.mxu0 %v2001_v36  ;;  %v1968_v8 = vld [vmem:[%s2389_s13 + $0xec] ss:$16 sps:$4 sm:$0xff]   ;;  %v2028_v9 = vld [vmem:[%s2387_s12 + $0xb0] ss:$8 sps:$4 sm:$0xff]   ;;  %v2031_v13 = vld [vmem:[%s2387_s12 + $0xc0] ss:$8 sps:$4 sm:$0xff]  }
  0x5e   : > { %1288 = vmatprep.subr.bf16.mxu0 %v2002_v37  ;;  %v1966_v11 = vld [vmem:[%s2389_s13 + $0xe8] ss:$16 sps:$4 sm:$0xff]   ;;  %v1971_v12 = vld [vmem:[%s2389_s13 + $0x10c] ss:$16 sps:$4 sm:$0xff]   ;;  %p1795_p11 = scmp.ne.s32.totalorder %s2165_s17, 1 }
  0x5f   : > { %817 = vmatpush1.bf16.msra.mxu1 %v1914_v15  ;;  %v1969_v15 = vld [vmem:[%s2389_s13 + $0x108] ss:$16 sps:$4 sm:$0xff]   ;;  %v1989_v28 = vld [vmem:[%s2389_s13 + $0x1cc] ss:$16 sps:$4 sm:$0xff]  }
  0x60   : > { %818 = vmatprep.subr.bf16.mxu1 %v1915_v16  ;;  %v1974_v16 = vld [vmem:[%s2389_s13 + $0x12c] ss:$16 sps:$4 sm:$0xff]   ;;  %v1984_v27 = vld [vmem:[%s2389_s13 + $0x1a8] ss:$16 sps:$4 sm:$0xff]  }
  0x61   : > { %1289 = vmatpush1.bf16.msra.mxu0 %v2004_v40  ;;  %v1992_v30 = vld [vmem:[%s2389_s13 + $0x1ec] ss:$16 sps:$4 sm:$0xff]   ;;  %v2037_v32 = vld [vmem:[%s2387_s12 + $0xe0] ss:$8 sps:$4 sm:$0xff]  }
  0x62   : > { %1290 = vmatprep.subr.bf16.mxu0 %v2005_v41  ;;  %v2038_v33 = vld [vmem:[%s2387_s12 + $0xf4] ss:$8 sps:$4 sm:$0xff]  }
  0x63   : > { %819 = vmatpush1.bf16.msra.mxu1 %v1917_v17  ;;  %v2034_v17 = vld [vmem:[%s2387_s12 + $0xd0] ss:$8 sps:$4 sm:$0xff]  }
  0x64   : > { %820 = vmatprep.subr.bf16.mxu1 %v1918_v18  ;;  %v2035_v18 = vld [vmem:[%s2387_s12 + $0xe4] ss:$8 sps:$4 sm:$0xff]  }
  0x65   : > { %1291 = vmatpush1.bf16.msra.mxu0 %v2007_v44  ;;  %v2044_v44 = vld [vmem:[%s2387_s12 + $0x110] ss:$8 sps:$4 sm:$0xff]  }
  0x66   : > { %1292 = vmatprep.subr.bf16.mxu0 %v2008_v46  ;;  %v2047_v46 = vld [vmem:[%s2387_s12 + $0x120] ss:$8 sps:$4 sm:$0xff]  }
  0x67   : > { %821 = vmatpush1.bf16.msra.mxu1 %v1920_v19  ;;  %v1972_v19 = vld [vmem:[%s2389_s13 + $0x128] ss:$16 sps:$4 sm:$0xff]  }
  0x68   : > { %822 = vmatprep.subr.bf16.mxu1 %v1921_v20  ;;  %v1977_v20 = vld [vmem:[%s2389_s13 + $0x14c] ss:$16 sps:$4 sm:$0xff]  }
  0x69   : > { %1293 = vmatpush1.bf16.msra.mxu0 %v2010_v49  ;;  %v2055_v49 = vld [vmem:[%s2387_s12 + $0x144] ss:$8 sps:$4 sm:$0xff]  }
  0x6a   : > { %1294 = vmatprep.subr.bf16.mxu0 %v2011_v50  ;;  %v2053_v50 = vld [vmem:[%s2387_s12 + $0x140] ss:$8 sps:$4 sm:$0xff]  }
  0x6b   : > { %823 = vmatpush1.bf16.msra.mxu1 %v1923_v21  ;;  %v1975_v21 = vld [vmem:[%s2389_s13 + $0x148] ss:$16 sps:$4 sm:$0xff]  }
  0x6c   : > { %824 = vmatprep.subr.bf16.mxu1 %v1924_v22  ;;  %v1980_v22 = vld [vmem:[%s2389_s13 + $0x16c] ss:$16 sps:$4 sm:$0xff]  }
  0x6d   : > { %1295 = vmatpush1.bf16.msra.mxu0 %v2013_v53  ;;  %v2061_v53 = vld [vmem:[%s2387_s12 + $0x164] ss:$8 sps:$4 sm:$0xff]  }
  0x6e   : > { %1296 = vmatprep.subr.bf16.mxu0 %v2014_v54  ;;  %v2059_v54 = vld [vmem:[%s2387_s12 + $0x160] ss:$8 sps:$4 sm:$0xff]  }
  0x6f   : > { %825 = vmatpush1.bf16.msra.mxu1 %v1926_v23  ;;  %v1978_v23 = vld [vmem:[%s2389_s13 + $0x168] ss:$16 sps:$4 sm:$0xff]  }
  0x70   : > { %826 = vmatprep.subr.bf16.mxu1 %v1927_v24  ;;  %v1983_v24 = vld [vmem:[%s2389_s13 + $0x18c] ss:$16 sps:$4 sm:$0xff]  }
  0x71   : > { %1297 = vmatpush1.bf16.msra.mxu0 %v2016_v57  ;;  %v2067_v57 = vld [vmem:[%s2387_s12 + $0x184] ss:$8 sps:$4 sm:$0xff]  }
  0x72   : > { %1298 = vmatprep.subr.bf16.mxu0 %v2017_v58  ;;  %v2065_v58 = vld [vmem:[%s2387_s12 + $0x180] ss:$8 sps:$4 sm:$0xff]  }
  0x73   : > { %827 = vmatpush1.bf16.msra.mxu1 %v1929_v25  ;;  %v1981_v25 = vld [vmem:[%s2389_s13 + $0x188] ss:$16 sps:$4 sm:$0xff]  }
  0x74   : > { %828 = vmatprep.subr.bf16.mxu1 %v1930_v26  ;;  %v1986_v26 = vld [vmem:[%s2389_s13 + $0x1ac] ss:$16 sps:$4 sm:$0xff]  }
  0x75   : > { %1299 = vmatpush1.bf16.msra.mxu0 %v2019_v61  ;;  %v2073_v61 = vld [vmem:[%s2387_s12 + $0x1a4] ss:$8 sps:$4 sm:$0xff]  }
  0x76   : > { %1300 = vmatprep.subr.bf16.mxu0 %v2020_v62  ;;  %v2071_v62 = vld [vmem:[%s2387_s12 + $0x1a0] ss:$8 sps:$4 sm:$0xff]  }
  0x77   : > { %829 = vmatpush1.bf16.msra.mxu1 %v1932_v29  ;;  %v1987_v29 = vld [vmem:[%s2389_s13 + $0x1c8] ss:$16 sps:$4 sm:$0xff]  }
  0x78   : > { %830 = vmatprep.subr.bf16.mxu1 %v1933_v31  ;;  %v1990_v31 = vld [vmem:[%s2389_s13 + $0x1e8] ss:$16 sps:$4 sm:$0xff]  }
  0x79   : > { %1301 = vmatpush1.bf16.msra.mxu0 %v2022_v1  ;;  %v2079_v1 = vld [vmem:[%s2387_s12 + $0x1c4] ss:$8 sps:$4 sm:$0xff]  }
  0x7a   : > { %1302 = vmatprep.subr.bf16.mxu0 %v2023_v2  ;;  %v2077_v2 = vld [vmem:[%s2387_s12 + $0x1c0] ss:$8 sps:$4 sm:$0xff]  }
  0x7b   : > { %831 = vmatpush1.bf16.msra.mxu1 %v1935_v34  ;;  %v2040_v34 = vld [vmem:[%s2387_s12 + $0xf0] ss:$8 sps:$4 sm:$0xff]  }
  0x7c   : > { %832 = vmatprep.subr.bf16.mxu1 %v1936_v35  ;;  %v2043_v35 = vld [vmem:[%s2387_s12 + $0x104] ss:$8 sps:$4 sm:$0xff]  }
  0x7d   : > { %1303 = vmatpush1.bf16.msra.mxu0 %v2025_v5  ;;  %v2085_v5 = vld [vmem:[%s2387_s12 + $0x1e4] ss:$8 sps:$4 sm:$0xff]  }
  0x7e   : > { %1304 = vmatprep.subr.bf16.mxu0 %v2026_v6  ;;  %v2083_v6 = vld [vmem:[%s2387_s12 + $0x1e0] ss:$8 sps:$4 sm:$0xff]  }
  0x7f   : > { %833 = vmatpush1.bf16.msra.mxu1 %v1938_v38 }
  0x80   : > { %834 = vmatprep.subr.bf16.mxu1 %v1939_v39 }
  0x81   : > { %1305 = vmatpush1.bf16.msra.mxu0 %v2028_v9  ;;  %v2086_v9 = vld [vmem:[%s2387_s12 + $0x1f0] ss:$8 sps:$4 sm:$0xff]  }
  0x82   : > { %1306 = vmatprep.subr.bf16.mxu0 %v2029_v10 }
  0x83   : > { %835 = vmatpush1.bf16.msra.mxu1 %v1941_v42  ;;  %v2041_v42 = vld [vmem:[%s2387_s12 + $0x100] ss:$8 sps:$4 sm:$0xff]  }
  0x84   : > { %847 = vmatprep.subr.bf16.mxu1 %v1947_v43  ;;  %v2046_v43 = vld [vmem:[%s2387_s12 + $0x114] ss:$8 sps:$4 sm:$0xff]  }
  0x85   : > { %1307 = vmatpush1.bf16.msra.mxu0 %v2031_v13 }
  0x86   : > { %837 = vmatmul.mubr.bf16.vlgmr.msra.gmra.mrb[0].mxu1 %v2444_v45 }
  0x87   : > { %848 = vmatpush1.bf16.msra.mxu1 %v1945_v47  ;;  %879 = vmatprep.mubr.bf16.mxu1 %v2408_v14  ;;  %v2032_v14 = vld [vmem:[%s2387_s12 + $0xd4] ss:$8 sps:$4 sm:$0xff]  }
  0x88   : > { %849 = vmatprep.subr.bf16.mxu1 %v1950_v48  ;;  %1308 = vmatprep.subr.bf16.mxu0 %v2032_v14  ;;  %v2052_v47 = vld [vmem:[%s2387_s12 + $0x134] ss:$8 sps:$4 sm:$0xff]   ;;  %v2050_v48 = vld [vmem:[%s2387_s12 + $0x130] ss:$8 sps:$4 sm:$0xff]  }
  0x89   : > { %1309 = vmatpush1.bf16.msra.mxu0 %v2034_v17 }
  0x8a   : > { %1310 = vmatprep.subr.bf16.mxu0 %v2035_v18  ;;  %v892_v18 = vld [vmem:[#allocation2 + $0x10] sm:$0xff] }
  0x8b   : > { %850 = vmatpush1.bf16.msra.mxu1 %v1948_v51  ;;  %v2058_v51 = vld [vmem:[%s2387_s12 + $0x154] ss:$8 sps:$4 sm:$0xff]  }
  0x8c   : > { %851 = vmatprep.subr.bf16.mxu1 %v1953_v52  ;;  %v2056_v52 = vld [vmem:[%s2387_s12 + $0x150] ss:$8 sps:$4 sm:$0xff]  }
  0x8d   : > { %1311 = vmatpush1.bf16.msra.mxu0 %v2037_v32  ;;  %v2094_v32 = vld [vmem:[%s2629_s3 + $0x10] sm:$0xff] (!%p1795_p11)  }
  0x8e   : > { %1312 = vmatprep.subr.bf16.mxu0 %v2038_v33  ;;  %v2095_v33 = vld [vmem:[%s2629_s3 + $0x58] sm:$0xff] (!%p1795_p11)  }
  0x8f   : > { %852 = vmatpush1.bf16.msra.mxu1 %v1951_v55  ;;  %v2064_v55 = vld [vmem:[%s2387_s12 + $0x174] ss:$8 sps:$4 sm:$0xff]  }
  0x90   : > { %853 = vmatprep.subr.bf16.mxu1 %v1956_v56  ;;  %v2062_v56 = vld [vmem:[%s2387_s12 + $0x170] ss:$8 sps:$4 sm:$0xff]  }
  0x91   : > { %1313 = vmatpush1.bf16.msra.mxu0 %v2040_v34  ;;  %v2096_v34 = vld [vmem:[%s2629_s3 + $0x18] sm:$0xff] (!%p1795_p11)  }
  0x92   : > { %1325 = vmatprep.subr.bf16.mxu0 %v2043_v35  ;;  %v2097_v35 = vld [vmem:[%s2629_s3 + $0x60] sm:$0xff] (!%p1795_p11)  }
  0x93   : > { %854 = vmatpush1.bf16.msra.mxu1 %v1954_v59  ;;  %v2070_v59 = vld [vmem:[%s2387_s12 + $0x194] ss:$8 sps:$4 sm:$0xff]  }
  0x94   : > { %855 = vmatprep.subr.bf16.mxu1 %v1959_v60  ;;  %v2068_v60 = vld [vmem:[%s2387_s12 + $0x190] ss:$8 sps:$4 sm:$0xff]  }
  0x97   : > { %856 = vmatpush1.bf16.msra.mxu1 %v1957_v63  ;;  %v2076_v63 = vld [vmem:[%s2387_s12 + $0x1b4] ss:$8 sps:$4 sm:$0xff]  }
  0x98   : > { %857 = vmatprep.subr.bf16.mxu1 %v1962_v0  ;;  %v2074_v0 = vld [vmem:[%s2387_s12 + $0x1b0] ss:$8 sps:$4 sm:$0xff]  }
  0x9b   : > { %858 = vmatpush1.bf16.msra.mxu1 %v1960_v3  ;;  %v2082_v3 = vld [vmem:[%s2387_s12 + $0x1d4] ss:$8 sps:$4 sm:$0xff]  }
  0x9c   : > { %859 = vmatprep.subr.bf16.mxu1 %v1965_v4  ;;  %v2080_v4 = vld [vmem:[%s2387_s12 + $0x1d0] ss:$8 sps:$4 sm:$0xff]  }
  0x9f   : > { %860 = vmatpush1.bf16.msra.mxu1 %v1963_v7  ;;  %v2088_v7 = vld [vmem:[%s2387_s12 + $0x1f4] ss:$8 sps:$4 sm:$0xff]  }
  0xa0   : > { %861 = vmatprep.subr.bf16.mxu1 %v1968_v8 }
  0xa3   : > { %862 = vmatpush1.bf16.msra.mxu1 %v1966_v11 }
  0xa4   : > { %863 = vmatprep.subr.bf16.mxu1 %v1971_v12 }
  0xa7   : > { %864 = vmatpush1.bf16.msra.mxu1 %v1969_v15  ;;  %v890_v15 = vld [vmem:[#allocation2] sm:$0xff] }
  0xa8   : > { %865 = vmatprep.subr.bf16.mxu1 %v1974_v16  ;;  %v891_v16 = vld [vmem:[#allocation2 + $0x8] sm:$0xff] }
  0xab   : > { %866 = vmatpush1.bf16.msra.mxu1 %v1972_v19 }
  0xac   : > { %867 = vmatprep.subr.bf16.mxu1 %v1977_v20 }
  0xaf   : > { %868 = vmatpush1.bf16.msra.mxu1 %v1975_v21  ;;  %v893_v21 = vld [vmem:[#allocation2 + $0x18] sm:$0xff] }
  0xb0   : > { %869 = vmatprep.subr.bf16.mxu1 %v1980_v22 }
  0xb3   : > { %870 = vmatpush1.bf16.msra.mxu1 %v1978_v23 }
  0xb4   : > { %871 = vmatprep.subr.bf16.mxu1 %v1983_v24 }
  0xb7   : > { %872 = vmatpush1.bf16.msra.mxu1 %v1981_v25 }
  0xb8   : > { %873 = vmatprep.subr.bf16.mxu1 %v1986_v26 }
  0xbb   : > { %874 = vmatpush1.bf16.msra.mxu1 %v1984_v27  ;;  %v2089_v27 = vld [vmem:[%s2629_s3 + $0x40] sm:$0xff] (!%p1795_p11)  }
  0xbc   : > { %875 = vmatprep.subr.bf16.mxu1 %v1989_v28  ;;  %v2090_v28 = vld [vmem:[%s2629_s3] sm:$0xff] (!%p1795_p11)  }
  0xbf   : > { %876 = vmatpush1.bf16.msra.mxu1 %v1987_v29  ;;  %v2091_v29 = vld [vmem:[%s2629_s3 + $0x48] sm:$0xff] (!%p1795_p11)  }
  0xc0   : > { %877 = vmatprep.subr.bf16.mxu1 %v1992_v30  ;;  %v2092_v30 = vld [vmem:[%s2629_s3 + $0x8] sm:$0xff] (!%p1795_p11)  }
  0xc3   : > { %878 = vmatpush1.bf16.msra.mxu1 %v1990_v31  ;;  %v2093_v31 = vld [vmem:[%s2629_s3 + $0x50] sm:$0xff] (!%p1795_p11)  }
  0xc6   : > { %880 = vmatmul.mubr.bf16.vlgmr.msra.gmra.mrb[4].mxu1 %v2444_v45  ;;  %v2049_v45 = vld [vmem:[%s2387_s12 + $0x124] ss:$8 sps:$4 sm:$0xff]  }
 0x159   : > { %v838_v36 = vpop.f32.mrb[0].mxu1 }
 0x15a   : > { %v840_v37 = vpop.f32.mrb[1].mxu1 }
 0x15b   : > { %v842_v38 = vpop.f32.mrb[2].mxu1 }
 0x15c   : > { %v894_v39 = vpack.c.bf16 %v842_v38, %v838_v36  ;;  %v844_v40 = vpop.f32.mrb[3].mxu1  ;;  %v2098_v36 = vld [vmem:[%s2629_s3 + $0x20] sm:$0xff] (!%p1795_p11)  }
 0x15d   : > { %v895_v41 = vpack.c.bf16 %v844_v40, %v840_v37  ;;  %v2099_v37 = vld [vmem:[%s2629_s3 + $0x68] sm:$0xff] (!%p1795_p11)  }
 0x15f   : > { %1314 = vmatprep.mubr.bf16.mxu0 %v895_v41  ;;  %v2100_v41 = vld [vmem:[%s2629_s3 + $0x28] sm:$0xff] (!%p1795_p11)  }
 0x160   : > { %1315 = vmatmul.mubr.bf16.vlgmr.msra.gmra.mrb[0].mxu0 %v894_v39 }
 0x161   : > { %1326 = vmatpush1.bf16.msra.mxu0 %v2041_v42  ;;  %v2101_v42 = vld [vmem:[%s2629_s3 + $0x70] sm:$0xff] (!%p1795_p11)  }
 0x162   : > { %1327 = vmatprep.subr.bf16.mxu0 %v2046_v43  ;;  %v2102_v43 = vld [vmem:[%s2629_s3 + $0x30] sm:$0xff] (!%p1795_p11)  }
 0x165   : > { %1328 = vmatpush1.bf16.msra.mxu0 %v2044_v44  ;;  %v2103_v44 = vld [vmem:[%s2629_s3 + $0x78] sm:$0xff] (!%p1795_p11)  }
 0x166   : > { %1329 = vmatprep.subr.bf16.mxu0 %v2049_v45  ;;  %v2104_v45 = vld [vmem:[%s2629_s3 + $0x38] sm:$0xff] (!%p1795_p11)  }
 0x169   : > { %1330 = vmatpush1.bf16.msra.mxu0 %v2047_v46 }
 0x16a   : > { %1331 = vmatprep.subr.bf16.mxu0 %v2052_v47 }
 0x16d   : > { %1332 = vmatpush1.bf16.msra.mxu0 %v2050_v48 }
 0x16e   : > { %1333 = vmatprep.subr.bf16.mxu0 %v2055_v49 }
 0x171   : > { %1334 = vmatpush1.bf16.msra.mxu0 %v2053_v50 }
 0x172   : > { %1335 = vmatprep.subr.bf16.mxu0 %v2058_v51 }
 0x175   : > { %1336 = vmatpush1.bf16.msra.mxu0 %v2056_v52 }
 0x176   : > { %1337 = vmatprep.subr.bf16.mxu0 %v2061_v53 }
 0x179   : > { %1338 = vmatpush1.bf16.msra.mxu0 %v2059_v54 }
 0x17a   : > { %1339 = vmatprep.subr.bf16.mxu0 %v2064_v55 }
 0x17d   : > { %1340 = vmatpush1.bf16.msra.mxu0 %v2062_v56 }
 0x17e   : > { %1341 = vmatprep.subr.bf16.mxu0 %v2067_v57 }
 0x181   : > { %1342 = vmatpush1.bf16.msra.mxu0 %v2065_v58 }
 0x182   : > { %1343 = vmatprep.subr.bf16.mxu0 %v2070_v59 }
 0x185   : > { %1344 = vmatpush1.bf16.msra.mxu0 %v2068_v60 }
 0x186   : > { %1345 = vmatprep.subr.bf16.mxu0 %v2073_v61 }
 0x189   : > { %1346 = vmatpush1.bf16.msra.mxu0 %v2071_v62 }
 0x18a   : > { %1347 = vmatprep.subr.bf16.mxu0 %v2076_v63 }
 0x18d   : > { %1348 = vmatpush1.bf16.msra.mxu0 %v2074_v0 }
 0x18e   : > { %1349 = vmatprep.subr.bf16.mxu0 %v2079_v1 }
 0x191   : > { %1350 = vmatpush1.bf16.msra.mxu0 %v2077_v2 }
 0x192   : > { %1351 = vmatprep.subr.bf16.mxu0 %v2082_v3 }
 0x195   : > { %1352 = vmatpush1.bf16.msra.mxu0 %v2080_v4 }
 0x196   : > { %1353 = vmatprep.subr.bf16.mxu0 %v2085_v5 }
 0x199   : > { %v881_v8 = vpop.f32.mrb[4].mxu1  ;;  %1354 = vmatpush1.bf16.msra.mxu0 %v2083_v6 }
 0x19a   : > { %v883_v10 = vpop.f32.mrb[5].mxu1  ;;  %1355 = vmatprep.subr.bf16.mxu0 %v2088_v7 }
 0x19b   : > { %v885_v11 = vpop.f32.mrb[6].mxu1 }
 0x19c   : > { %v896_v12 = vpack.c.bf16 %v885_v11, %v881_v8  ;;  %v887_v13 = vpop.f32.mrb[7].mxu1 }
 0x19d   : > { %v897_v14 = vpack.c.bf16 %v887_v13, %v883_v10  ;;  %1356 = vmatpush1.bf16.msra.mxu0 %v2086_v9 }
 0x19e   : > { %1818 = vmatprep.subr.bf16.mxu0 (!%p1795_p11), %v2089_v27 }
 0x19f   : > { %1357 = vmatprep.mubr.bf16.mxu0 %v897_v14 }
 0x1a0   : > { %1358 = vmatmul.mubr.bf16.vlgmr.msra.gmra.mrb[0].mxu0 %v896_v12 }
 0x1a1   : > { %1819 = vmatpush3.bf16.msra.mxu0 (!%p1795_p11), %v2090_v28 }
 0x1a2   : > { %1820 = vmatprep.subr.bf16.mxu0 (!%p1795_p11), %v2091_v29 }
 0x1a5   : > { %1821 = vmatpush3.bf16.msra.mxu0 (!%p1795_p11), %v2092_v30 }
 0x1a6   : > { %1822 = vmatprep.subr.bf16.mxu0 (!%p1795_p11), %v2093_v31 }
 0x1a9   : > { %1823 = vmatpush3.bf16.msra.mxu0 (!%p1795_p11), %v2094_v32 }
 0x1aa   : > { %1824 = vmatprep.subr.bf16.mxu0 (!%p1795_p11), %v2095_v33 }
 0x1ad   : > { %1825 = vmatpush3.bf16.msra.mxu0 (!%p1795_p11), %v2096_v34 }
 0x1ae   : > { %1826 = vmatprep.subr.bf16.mxu0 (!%p1795_p11), %v2097_v35 }
 0x1b1   : > { %1827 = vmatpush3.bf16.msra.mxu0 (!%p1795_p11), %v2098_v36 }
 0x1b2   : > { %1828 = vmatprep.subr.bf16.mxu0 (!%p1795_p11), %v2099_v37 }
 0x1b5   : > { %1829 = vmatpush3.bf16.msra.mxu0 (!%p1795_p11), %v2100_v41 }
 0x1b6   : > { %1830 = vmatprep.subr.bf16.mxu0 (!%p1795_p11), %v2101_v42 }
 0x1b9   : > { %1831 = vmatpush3.bf16.msra.mxu0 (!%p1795_p11), %v2102_v43 }
 0x1ba   : > { %1832 = vmatprep.subr.bf16.mxu0 (!%p1795_p11), %v2103_v44 }
 0x1bd   : > { %1833 = vmatpush3.bf16.msra.mxu0 (!%p1795_p11), %v2104_v45 }
 0x273   : > { %v1359_v17 = vpop.f32.mrb[0].mxu0  ;;  %1379 = sbr.rel (%p1795_p11) target bundleno = 862 (0x35e), region = 67 }
 0x274   : > { %v1368_v19 = vadd.f32 %v1359_v17, %v890_v15  ;;  %v1361_v20 = vpop.f32.mrb[1].mxu0 }
 0x275   : > { %v1369_v22 = vadd.f32 %v1361_v20, %v891_v16  ;;  %v1363_v23 = vpop.f32.mrb[2].mxu0 }
 0x276   : > { %1372 = vst [vmem:[#allocation2] sm:$0xff] %v1368_v19  ;;  %v1370_v24 = vadd.f32 %v1363_v23, %v892_v18  ;;  %v1365_v25 = vpop.f32.mrb[3].mxu0 }
 0x277   : > { %1373 = vst [vmem:[#allocation2 + $0x8] sm:$0xff] %v1369_v22  ;;  %v1371_v26 = vadd.f32 %v1365_v25, %v893_v21 }
 0x278   : > { %1374 = vst [vmem:[#allocation2 + $0x10] sm:$0xff] %v1370_v24 }
 0x279   : > { %1375 = vst [vmem:[#allocation2 + $0x18] sm:$0xff] %v1371_v26 }
 0x27d   : > { %v1380_v46 = vld [vmem:[#allocation2] sm:$0xff] }
 0x27e   : > { %v1381_v38 = vld [vmem:[#allocation2 + $0x8] sm:$0xff] }
 0x27f   : > { %v1382_v47 = vld [vmem:[#allocation2 + $0x10] sm:$0xff] }
 0x280   : > { %v1383_v39 = vld [vmem:[#allocation2 + $0x18] sm:$0xff]  ;;  %v1384_v48 = vpack.c.bf16 %v1382_v47, %v1380_v46 }
 0x281   : > { %v1385_v40 = vpack.c.bf16 %v1383_v39, %v1381_v38 }
 0x283   : > { %1546 = vmatprep.mubr.bf16.mxu0 %v1385_v40 }
 0x284   : > { %1547 = vmatmul.mubr.bf16.vlgmr.msra.gmra.mrb[0].mxu0 %v1384_v48 }
 0x357   : > { %v1834_v49 = vpop.f32.mrb[0].mxu0 }
 0x358   : > { %v1835_v50 = vpop.f32.mrb[1].mxu0 }
 0x359   : > { %v1836_v51 = vadd.f32 %v1835_v50, %v1834_v49  ;;  %v1837_v52 = vpop.f32.mrb[2].mxu0 }
 0x35a   : > { %v1838_v53 = vpop.f32.mrb[3].mxu0 }
 0x35b   : > { %1555 = vst [vmem:[#allocation4] sm:$0xff] %v1836_v51  ;;  %v1839_v54 = vadd.f32 %v1838_v53, %v1837_v52 }
 0x35d   : > { %1556 = vst [vmem:[#allocation4 + $0x8] sm:$0xff] %v1839_v54 }
 0x35e PF: > { %p2585_p12 = scmp.eq.s32.totalorder %s1652_s20, 1  ;;  %s2176_s11 = smov [#allocation4]  }
 0x35f   : > { %s1566_s12 = sshll.u32 %s2176_s11, 4  ;;  %s1567_s12 = int_to_ptr.vmem [resolvable:$true] %s1566_s12 }
 0x360   : > { %s2105_s13 = scalar_lea.vmem %s1567_s12, 256  ;;  %p2112_p2 = scmp.lt.s32.totalorder %s1567_s12, %s1567_s12 }
 0x361   : > { %p2106_p13 = scmp.ne.s32.totalorder %s1567_s12, %s2105_s13  ;;  %p2113_p3 = scmp.lt.s32.totalorder %s2105_s13, %s2105_s13 }
 0x363   : > { %p2107_p0 = pnand %p2106_p13, %p2585_p12  ;;  %p2114_p4 = por %p2113_p3, %p2112_p2 }
 0x365   : > { %p2108_p1 = pneg %p2107_p0 }
 0x367   : > { %p2115_p5 = pnand %p2114_p4, %p2108_p1 }
 0x369   : > { %2118 = shalt.err (!%p2115_p5)
}
 0x36a   : > { %s2119_s20 = scalar_lea.hbm %s2630_s4, 256 }
 0x36b   : > { %p2120_p6 = scmp.ne.s32.totalorder %s2630_s4, %s2119_s20  ;;  %p2125_p9 = scmp.lt.u32.totalorder %s2119_s20, %s2630_s4 }
 0x36d   : > { %p2121_p7 = pnand %p2120_p6, %p2585_p12 }
 0x36f   : > { %p2122_p8 = pneg %p2121_p7 }
 0x371   : > { %p2127_p10 = pnand %p2125_p9, %p2122_p8 }
 0x373   : > { %2130 = shalt.err (!%p2127_p10)
}
 0x374   : > { %s2177_s27 = smov 128   ;;  %s2178_s28 = smov 8  }
 0x375   : > { %1845 = dma.vmem_to_hbm [thread:$0]  (%p2585_p12), %s1567_s12, 256, %s2630_s4, [#allocation5], %s2177_s27, %s2177_s27, %s2178_s28  }
 0x376   : > { %2152 = dma.done.wait (%p2585_p12), [#allocation5], 256  }
 0x377   : > { %2154 = vsyncadd (%p2585_p12), [#allocation5], 4294967040 }
 0x378 PF: > { %s15_s19 = sadd.s32 1, %s2173_s19   ;;  %s2632_s15 = smov %s2161_s16 }
 0x379   : > { %p12_p11 = scmp.ge.s32.totalorder %s15_s19, 4   ;;  %s2633_s16 = smov %s2240_s24 }
 0x37a   : > { %s2634_s17 = smov %s2169_s18  ;;  %s2635_s18 = smov %s2637_s21 }
 0x37b   :  { %14 = sbr.rel (!%p12_p11) target bundleno = 3 (0x3), region = 106 }
 0x382   :  { %1582 = vsyncpa [#allocation5], 1 }
 0x383   :  { %1584 = vsyncpa [#allocation5 + $0x1], 1 }

// kernel: _lambda_.2
= control target key start
LH: loop header
LB: loop body
LE: loop exit
PB: predicated region body
PF: predicated region fallthrough
CT: control target
= control target key end

     0   :  { %s2239_s15 = smov 0   ;;  %s2241_s16 = smov 0   ;;  %s2635_s0 = inlined_call_operand.vmem [shape: bf16[16,128], index: 0, kind: input, shape index: {}]   ;;  %s2636_s1 = inlined_call_operand.vmem [shape: bf16[128,256], index: 1, kind: input, shape index: {}]   ;;  %s2637_s2 = inlined_call_operand.vmem [shape: bf16[256,1024], index: 2, kind: input, shape index: {}]   ;;  %s2638_s3 = inlined_call_operand.vmem [shape: bf16[1024,256], index: 3, kind: input, shape index: {}]   ;;  %s2639_s4 = inlined_call_operand.vmem [shape: bf16[16,256], index: 4, kind: output, shape index: {}]  }
   0x1   :  { %s2243_s17 = smov 0   ;;  %s2245_s18 = smov 0  }
   0x2   :  { %s2247_s19 = smov 0  }
   0x3 LB: > { %s23_s20 = sadd.s32 1, %s2206_s18  ;;  %p87_p1 = scmp.ne.s32.totalorder %s2198_s16, %s2194_s15  ;;  %s2210_s19 = sphi %s2247_s19, %s14_s19   ;;  %s2206_s18 = sphi %s2245_s18, %s2643_s18   ;;  %s2202_s17 = sphi %s2243_s17, %s2642_s17   ;;  %s2198_s16 = sphi %s2241_s16, %s2641_s16   ;;  %s2194_s15 = sphi %s2239_s15, %s2640_s15  }
   0x4   : > { %p24_p0 = scmp.ge.s32.totalorder %s23_s20, 2  ;;  %p88_p2 = scmp.eq.s32.totalorder %s2210_s19, 0 }
   0x5   : > { %s80_s22 = sadd.s32 1, %s2198_s16  ;;  %p1703_p5 = scmp.ge.s32.totalorder %s2210_s19, 2 }
   0x6   : > { %s2645_s20 = smov (%p24_p0, %s23_s20), 0  ;;  %p89_p3 = por %p88_p2, %p87_p1 }
   0x7   : > { %s77_s21 = ssub.s32 %s2206_s18, %s2645_s20  ;;  %177 = sbr.rel (%p1703_p5) target bundleno = 50 (0x32), region = 24 }
   0x8   : > { %p78_p4 = scmp.eq.s32.totalorder %s77_s21, 0 }
   0xa   : > { %s2274_s23 = scalar_select %p78_p4, %s2198_s16, %s80_s22  }
   0xe   : > { %180 = sbr.rel (!%p89_p3) target bundleno = 50 (0x32), region = 28  ;;  %s182_s24 = sand.u32 (%p89_p3), 1, %s2198_s16  }
   0xf   : > { %s1873_s25 = sshll.u32 (%p89_p3), %s2206_s18, 4  ;;  %s1704_s26 = sshll.u32 (%p89_p3), %s182_s24, 9 }
  0x10   : > { %s2282_s29 = scalar_lea.vmem (%p89_p3), %s2637_s2, %s1873_s25  ;;  %s2287_s30 = scalar_lea.vmem (%p89_p3), [#allocation4], %s1704_s26 }
  0x11   : > { %v200_v0 = vld [vmem:[%s2282_s29] sm:$0xff] (%p89_p3)  ;;  %v202_v1 = vld [vmem:[%s2282_s29 + $0x8] sm:$0xff] (%p89_p3) }
  0x12   : > { %v204_v2 = vld [vmem:[%s2282_s29 + $0x20] sm:$0xff] (%p89_p3)  ;;  %201 = vst [vmem:[%s2287_s30] sm:$0xff] (%p89_p3), %v200_v0  ;;  %203 = vst [vmem:[%s2287_s30 + $0x8] sm:$0xff] (%p89_p3), %v202_v1  ;;  %v206_v3 = vld [vmem:[%s2282_s29 + $0x28] sm:$0xff] (%p89_p3) }
  0x13   : > { %205 = vst [vmem:[%s2287_s30 + $0x10] sm:$0xff] (%p89_p3), %v204_v2  ;;  %v208_v4 = vld [vmem:[%s2282_s29 + $0x40] sm:$0xff] (%p89_p3)  ;;  %v210_v5 = vld [vmem:[%s2282_s29 + $0x48] sm:$0xff] (%p89_p3)  ;;  %207 = vst [vmem:[%s2287_s30 + $0x18] sm:$0xff] (%p89_p3), %v206_v3 }
  0x14   : > { %209 = vst [vmem:[%s2287_s30 + $0x20] sm:$0xff] (%p89_p3), %v208_v4  ;;  %211 = vst [vmem:[%s2287_s30 + $0x28] sm:$0xff] (%p89_p3), %v210_v5  ;;  %v212_v6 = vld [vmem:[%s2282_s29 + $0x60] sm:$0xff] (%p89_p3)  ;;  %v214_v7 = vld [vmem:[%s2282_s29 + $0x68] sm:$0xff] (%p89_p3) }
  0x15   : > { %v216_v8 = vld [vmem:[%s2282_s29 + $0x80] sm:$0xff]  ;;  %213 = vst [vmem:[%s2287_s30 + $0x30] sm:$0xff] %v212_v6  ;;  %215 = vst [vmem:[%s2287_s30 + $0x38] sm:$0xff] %v214_v7  ;;  %v218_v9 = vld [vmem:[%s2282_s29 + $0x88] sm:$0xff] }
  0x16   : > { %217 = vst [vmem:[%s2287_s30 + $0x40] sm:$0xff] %v216_v8  ;;  %v220_v10 = vld [vmem:[%s2282_s29 + $0xa0] sm:$0xff]  ;;  %v222_v11 = vld [vmem:[%s2282_s29 + $0xa8] sm:$0xff]  ;;  %219 = vst [vmem:[%s2287_s30 + $0x48] sm:$0xff] %v218_v9 }
  0x17   : > { %221 = vst [vmem:[%s2287_s30 + $0x50] sm:$0xff] %v220_v10  ;;  %223 = vst [vmem:[%s2287_s30 + $0x58] sm:$0xff] %v222_v11  ;;  %v224_v12 = vld [vmem:[%s2282_s29 + $0xc0] sm:$0xff]  ;;  %v226_v13 = vld [vmem:[%s2282_s29 + $0xc8] sm:$0xff] }
  0x18   : > { %v228_v14 = vld [vmem:[%s2282_s29 + $0xe0] sm:$0xff]  ;;  %225 = vst [vmem:[%s2287_s30 + $0x60] sm:$0xff] %v224_v12  ;;  %227 = vst [vmem:[%s2287_s30 + $0x68] sm:$0xff] %v226_v13  ;;  %v230_v15 = vld [vmem:[%s2282_s29 + $0xe8] sm:$0xff] }
  0x19   : > { %229 = vst [vmem:[%s2287_s30 + $0x70] sm:$0xff] %v228_v14  ;;  %v232_v16 = vld [vmem:[%s2282_s29 + $0x100] sm:$0xff]  ;;  %v234_v17 = vld [vmem:[%s2282_s29 + $0x108] sm:$0xff]  ;;  %231 = vst [vmem:[%s2287_s30 + $0x78] sm:$0xff] %v230_v15 }
  0x1a   : > { %233 = vst [vmem:[%s2287_s30 + $0x80] sm:$0xff] %v232_v16  ;;  %235 = vst [vmem:[%s2287_s30 + $0x88] sm:$0xff] %v234_v17  ;;  %v236_v18 = vld [vmem:[%s2282_s29 + $0x120] sm:$0xff]  ;;  %v238_v19 = vld [vmem:[%s2282_s29 + $0x128] sm:$0xff] }
  0x1b   : > { %v240_v20 = vld [vmem:[%s2282_s29 + $0x140] sm:$0xff]  ;;  %237 = vst [vmem:[%s2287_s30 + $0x90] sm:$0xff] %v236_v18  ;;  %239 = vst [vmem:[%s2287_s30 + $0x98] sm:$0xff] %v238_v19  ;;  %v242_v21 = vld [vmem:[%s2282_s29 + $0x148] sm:$0xff] }
  0x1c   : > { %241 = vst [vmem:[%s2287_s30 + $0xa0] sm:$0xff] %v240_v20  ;;  %v244_v22 = vld [vmem:[%s2282_s29 + $0x160] sm:$0xff]  ;;  %v246_v23 = vld [vmem:[%s2282_s29 + $0x168] sm:$0xff]  ;;  %243 = vst [vmem:[%s2287_s30 + $0xa8] sm:$0xff] %v242_v21 }
  0x1d   : > { %245 = vst [vmem:[%s2287_s30 + $0xb0] sm:$0xff] %v244_v22  ;;  %247 = vst [vmem:[%s2287_s30 + $0xb8] sm:$0xff] %v246_v23  ;;  %v248_v24 = vld [vmem:[%s2282_s29 + $0x180] sm:$0xff]  ;;  %v250_v25 = vld [vmem:[%s2282_s29 + $0x188] sm:$0xff] }
  0x1e   : > { %v252_v26 = vld [vmem:[%s2282_s29 + $0x1a0] sm:$0xff]  ;;  %249 = vst [vmem:[%s2287_s30 + $0xc0] sm:$0xff] %v248_v24  ;;  %251 = vst [vmem:[%s2287_s30 + $0xc8] sm:$0xff] %v250_v25  ;;  %v254_v27 = vld [vmem:[%s2282_s29 + $0x1a8] sm:$0xff] }
  0x1f   : > { %253 = vst [vmem:[%s2287_s30 + $0xd0] sm:$0xff] %v252_v26  ;;  %v256_v28 = vld [vmem:[%s2282_s29 + $0x1c0] sm:$0xff]  ;;  %v258_v29 = vld [vmem:[%s2282_s29 + $0x1c8] sm:$0xff]  ;;  %255 = vst [vmem:[%s2287_s30 + $0xd8] sm:$0xff] %v254_v27 }
  0x20   : > { %257 = vst [vmem:[%s2287_s30 + $0xe0] sm:$0xff] %v256_v28  ;;  %259 = vst [vmem:[%s2287_s30 + $0xe8] sm:$0xff] %v258_v29  ;;  %v260_v30 = vld [vmem:[%s2282_s29 + $0x1e0] sm:$0xff]  ;;  %v262_v31 = vld [vmem:[%s2282_s29 + $0x1e8] sm:$0xff] }
  0x21   : > { %v264_v32 = vld [vmem:[%s2282_s29 + $0x200] sm:$0xff]  ;;  %261 = vst [vmem:[%s2287_s30 + $0xf0] sm:$0xff] %v260_v30  ;;  %263 = vst [vmem:[%s2287_s30 + $0xf8] sm:$0xff] %v262_v31  ;;  %v266_v33 = vld [vmem:[%s2282_s29 + $0x208] sm:$0xff] }
  0x22   : > { %265 = vst [vmem:[%s2287_s30 + $0x100] sm:$0xff] %v264_v32  ;;  %v268_v34 = vld [vmem:[%s2282_s29 + $0x220] sm:$0xff]  ;;  %v270_v35 = vld [vmem:[%s2282_s29 + $0x228] sm:$0xff]  ;;  %267 = vst [vmem:[%s2287_s30 + $0x108] sm:$0xff] %v266_v33 }
  0x23   : > { %269 = vst [vmem:[%s2287_s30 + $0x110] sm:$0xff] %v268_v34  ;;  %271 = vst [vmem:[%s2287_s30 + $0x118] sm:$0xff] %v270_v35  ;;  %v272_v36 = vld [vmem:[%s2282_s29 + $0x240] sm:$0xff]  ;;  %v274_v37 = vld [vmem:[%s2282_s29 + $0x248] sm:$0xff] }
  0x24   : > { %v276_v38 = vld [vmem:[%s2282_s29 + $0x260] sm:$0xff]  ;;  %273 = vst [vmem:[%s2287_s30 + $0x120] sm:$0xff] %v272_v36  ;;  %275 = vst [vmem:[%s2287_s30 + $0x128] sm:$0xff] %v274_v37  ;;  %v278_v39 = vld [vmem:[%s2282_s29 + $0x268] sm:$0xff] }
  0x25   : > { %277 = vst [vmem:[%s2287_s30 + $0x130] sm:$0xff] %v276_v38  ;;  %v280_v40 = vld [vmem:[%s2282_s29 + $0x280] sm:$0xff]  ;;  %v282_v41 = vld [vmem:[%s2282_s29 + $0x288] sm:$0xff]  ;;  %279 = vst [vmem:[%s2287_s30 + $0x138] sm:$0xff] %v278_v39 }
  0x26   : > { %281 = vst [vmem:[%s2287_s30 + $0x140] sm:$0xff] %v280_v40  ;;  %283 = vst [vmem:[%s2287_s30 + $0x148] sm:$0xff] %v282_v41  ;;  %v284_v42 = vld [vmem:[%s2282_s29 + $0x2a0] sm:$0xff]  ;;  %v286_v43 = vld [vmem:[%s2282_s29 + $0x2a8] sm:$0xff] }
  0x27   : > { %v288_v44 = vld [vmem:[%s2282_s29 + $0x2c0] sm:$0xff]  ;;  %285 = vst [vmem:[%s2287_s30 + $0x150] sm:$0xff] %v284_v42  ;;  %287 = vst [vmem:[%s2287_s30 + $0x158] sm:$0xff] %v286_v43  ;;  %v290_v45 = vld [vmem:[%s2282_s29 + $0x2c8] sm:$0xff] }
  0x28   : > { %289 = vst [vmem:[%s2287_s30 + $0x160] sm:$0xff] %v288_v44  ;;  %v292_v46 = vld [vmem:[%s2282_s29 + $0x2e0] sm:$0xff]  ;;  %v294_v47 = vld [vmem:[%s2282_s29 + $0x2e8] sm:$0xff]  ;;  %291 = vst [vmem:[%s2287_s30 + $0x168] sm:$0xff] %v290_v45 }
  0x29   : > { %293 = vst [vmem:[%s2287_s30 + $0x170] sm:$0xff] %v292_v46  ;;  %295 = vst [vmem:[%s2287_s30 + $0x178] sm:$0xff] %v294_v47  ;;  %v296_v48 = vld [vmem:[%s2282_s29 + $0x300] sm:$0xff]  ;;  %v298_v49 = vld [vmem:[%s2282_s29 + $0x308] sm:$0xff] }
  0x2a   : > { %v300_v50 = vld [vmem:[%s2282_s29 + $0x320] sm:$0xff]  ;;  %297 = vst [vmem:[%s2287_s30 + $0x180] sm:$0xff] %v296_v48  ;;  %299 = vst [vmem:[%s2287_s30 + $0x188] sm:$0xff] %v298_v49  ;;  %v302_v51 = vld [vmem:[%s2282_s29 + $0x328] sm:$0xff] }
  0x2b   : > { %301 = vst [vmem:[%s2287_s30 + $0x190] sm:$0xff] %v300_v50  ;;  %v304_v52 = vld [vmem:[%s2282_s29 + $0x340] sm:$0xff]  ;;  %v306_v53 = vld [vmem:[%s2282_s29 + $0x348] sm:$0xff]  ;;  %303 = vst [vmem:[%s2287_s30 + $0x198] sm:$0xff] %v302_v51 }
  0x2c   : > { %305 = vst [vmem:[%s2287_s30 + $0x1a0] sm:$0xff] %v304_v52  ;;  %307 = vst [vmem:[%s2287_s30 + $0x1a8] sm:$0xff] %v306_v53  ;;  %v308_v54 = vld [vmem:[%s2282_s29 + $0x360] sm:$0xff]  ;;  %v310_v55 = vld [vmem:[%s2282_s29 + $0x368] sm:$0xff] }
  0x2d   : > { %v312_v56 = vld [vmem:[%s2282_s29 + $0x380] sm:$0xff]  ;;  %309 = vst [vmem:[%s2287_s30 + $0x1b0] sm:$0xff] %v308_v54  ;;  %311 = vst [vmem:[%s2287_s30 + $0x1b8] sm:$0xff] %v310_v55  ;;  %v314_v57 = vld [vmem:[%s2282_s29 + $0x388] sm:$0xff] }
  0x2e   : > { %313 = vst [vmem:[%s2287_s30 + $0x1c0] sm:$0xff] %v312_v56  ;;  %v316_v58 = vld [vmem:[%s2282_s29 + $0x3a0] sm:$0xff]  ;;  %v318_v59 = vld [vmem:[%s2282_s29 + $0x3a8] sm:$0xff]  ;;  %315 = vst [vmem:[%s2287_s30 + $0x1c8] sm:$0xff] %v314_v57 }
  0x2f   : > { %317 = vst [vmem:[%s2287_s30 + $0x1d0] sm:$0xff] %v316_v58  ;;  %319 = vst [vmem:[%s2287_s30 + $0x1d8] sm:$0xff] %v318_v59  ;;  %v320_v60 = vld [vmem:[%s2282_s29 + $0x3c0] sm:$0xff]  ;;  %v322_v61 = vld [vmem:[%s2282_s29 + $0x3c8] sm:$0xff] }
  0x30   : > { %v324_v62 = vld [vmem:[%s2282_s29 + $0x3e0] sm:$0xff]  ;;  %321 = vst [vmem:[%s2287_s30 + $0x1e0] sm:$0xff] %v320_v60  ;;  %323 = vst [vmem:[%s2287_s30 + $0x1e8] sm:$0xff] %v322_v61  ;;  %v326_v63 = vld [vmem:[%s2282_s29 + $0x3e8] sm:$0xff] }
  0x31   : > { %325 = vst [vmem:[%s2287_s30 + $0x1f0] sm:$0xff] %v324_v62  ;;  %327 = vst [vmem:[%s2287_s30 + $0x1f8] sm:$0xff] %v326_v63 }
  0x32 PF: > { %p1707_p6 = scmp.ge.s32.totalorder %s2210_s19, 1  ;;  %p342_p7 = scmp.lt.s32.totalorder %s2210_s19, 3 }
  0x34   : > { %p343_p8 = pnand %p1707_p6, %p342_p7 }
  0x35   : > { %s349_s5 = sand.u32 (!%p343_p8), 1, %s2194_s15   ;;  %s1709_s6 = sshll.u32 (!%p343_p8), %s2202_s17, 6 }
  0x36   : > { %346 = sbr.rel (%p343_p8) target bundleno = 916 (0x394), region = 55  ;;  %s1708_s7 = sshll.u32 (!%p343_p8), %s349_s5, 9 }
  0x37   : > { %p394_p9 = scmp.lt.s32.totalorder (!%p343_p8), %s1709_s6, 127  ;;  %s2423_s12 = scalar_lea.vmem (!%p343_p8), [#allocation4], %s1708_s7 }
  0x38   : > { %p1712_p10 = scmp.ne.s32.totalorder (!%p343_p8), %s2202_s17, 0 }
  0x3d   : > { %s2647_s6 = smov (!%p394_p9, %s1709_s6), 127  ;;  %411 = sbr.rel (%p1712_p10) target bundleno = 313 (0x139), region = 63 }
  0x3e   : > { %s1874_s8 = sshll.u32 %s2647_s6, 3  ;;  %v1923_v0 = vld [vmem:[%s2636_s1 + $0x4] ss:$8 sps:$4 sm:$0xff] (!%p1712_p10)   ;;  %v1925_v1 = vld [vmem:[%s2636_s1] ss:$8 sps:$4 sm:$0xff] (!%p1712_p10)   ;;  %v2212_v2 = vmov (!%p1712_p10), 0  }
  0x3f   : > { %s2421_s11 = scalar_lea.vmem %s2638_s3, %s1874_s8  ;;  %548 = vmatprep.mubr.bf16.mxu0 (!%p1712_p10), %v2212_v2  ;;  %516 = vmatprep.subr.bf16.mxu0 (!%p1712_p10), %v1923_v0  ;;  %v1926_v3 = vld [vmem:[%s2636_s1 + $0x14] ss:$8 sps:$4 sm:$0xff] (!%p1712_p10)   ;;  %v1928_v4 = vld [vmem:[%s2636_s1 + $0x10] ss:$8 sps:$4 sm:$0xff] (!%p1712_p10)   ;;  %v1929_v5 = vld [vmem:[%s2636_s1 + $0x24] ss:$8 sps:$4 sm:$0xff] (!%p1712_p10)  }
  0x40   : > { %517 = vmatpush1.bf16.msra.mxu0 (!%p1712_p10), %v1925_v1  ;;  %v1931_v6 = vld [vmem:[%s2636_s1 + $0x20] ss:$8 sps:$4 sm:$0xff] (!%p1712_p10)   ;;  %v1932_v7 = vld [vmem:[%s2636_s1 + $0x34] ss:$8 sps:$4 sm:$0xff] (!%p1712_p10)   ;;  %v1934_v8 = vld [vmem:[%s2636_s1 + $0x30] ss:$8 sps:$4 sm:$0xff] (!%p1712_p10)  }
  0x41   : > { %518 = vmatprep.subr.bf16.mxu0 (!%p1712_p10), %v1926_v3  ;;  %v1935_v9 = vld [vmem:[%s2636_s1 + $0x44] ss:$8 sps:$4 sm:$0xff] (!%p1712_p10)   ;;  %v1937_v10 = vld [vmem:[%s2636_s1 + $0x40] ss:$8 sps:$4 sm:$0xff] (!%p1712_p10)   ;;  %v1938_v11 = vld [vmem:[%s2636_s1 + $0x54] ss:$8 sps:$4 sm:$0xff] (!%p1712_p10)  }
  0x42   : > { %v1940_v12 = vld [vmem:[%s2636_s1 + $0x50] ss:$8 sps:$4 sm:$0xff] (!%p1712_p10)   ;;  %v1941_v13 = vld [vmem:[%s2636_s1 + $0x64] ss:$8 sps:$4 sm:$0xff] (!%p1712_p10)   ;;  %v1943_v14 = vld [vmem:[%s2636_s1 + $0x60] ss:$8 sps:$4 sm:$0xff] (!%p1712_p10)  }
  0x43   : > { %v1944_v15 = vld [vmem:[%s2636_s1 + $0x74] ss:$8 sps:$4 sm:$0xff] (!%p1712_p10)   ;;  %v1946_v16 = vld [vmem:[%s2636_s1 + $0x70] ss:$8 sps:$4 sm:$0xff] (!%p1712_p10)   ;;  %v1947_v17 = vld [vmem:[%s2635_s0] sm:$0xff] (!%p1712_p10)   ;;  %v2213_v18 = vmov (!%p1712_p10), 0.0  }
  0x44   : > { %519 = vmatpush1.bf16.msra.mxu0 %v1928_v4  ;;  %563 = vst [vmem:[#allocation3] sm:$0xff] %v2213_v18  ;;  %564 = vst [vmem:[#allocation3 + $0x8] sm:$0xff] %v2213_v18 }
  0x45   : > { %520 = vmatprep.subr.bf16.mxu0 %v1929_v5  ;;  %565 = vst [vmem:[#allocation3 + $0x10] sm:$0xff] %v2213_v18  ;;  %566 = vst [vmem:[#allocation3 + $0x18] sm:$0xff] %v2213_v18 }
  0x48   : > { %521 = vmatpush1.bf16.msra.mxu0 %v1931_v6 }
  0x49   : > { %522 = vmatprep.subr.bf16.mxu0 %v1932_v7 }
  0x4c   : > { %523 = vmatpush1.bf16.msra.mxu0 %v1934_v8 }
  0x4d   : > { %524 = vmatprep.subr.bf16.mxu0 %v1935_v9 }
  0x50   : > { %525 = vmatpush1.bf16.msra.mxu0 %v1937_v10 }
  0x51   : > { %526 = vmatprep.subr.bf16.mxu0 %v1938_v11 }
  0x54   : > { %527 = vmatpush1.bf16.msra.mxu0 %v1940_v12 }
  0x55   : > { %528 = vmatprep.subr.bf16.mxu0 %v1941_v13 }
  0x58   : > { %529 = vmatpush1.bf16.msra.mxu0 %v1943_v14 }
  0x59   : > { %530 = vmatprep.subr.bf16.mxu0 %v1944_v15 }
  0x5c   : > { %531 = vmatpush1.bf16.msra.mxu0 %v1946_v16 }
  0x5f   : > { %549 = vmatmul.mubr.bf16.vlgmr.msra.gmra.mrb[0].mxu0 %v1947_v17 }
 0x132   : > { %v550_v19 = vpop.f32.mrb[0].mxu0 }
 0x133   : > { %v552_v20 = vpop.f32.mrb[1].mxu0 }
 0x134   : > { %v554_v21 = vpop.f32.mrb[2].mxu0 }
 0x135   : > { %v559_v22 = vpack.c.bf16 %v554_v21, %v550_v19  ;;  %v556_v23 = vpop.f32.mrb[3].mxu0 }
 0x136   : > { %v560_v24 = vpack.c.bf16 %v556_v23, %v552_v20 }
 0x137   : > { %561 = vst [vmem:[#allocation2] sm:$0xff] %v559_v22 }
 0x138   : > { %562 = vst [vmem:[#allocation2 + $0x8] sm:$0xff] %v560_v24 }
 0x139 PF: > { %v1948_v25 = vld [vmem:[%s2423_s12 + $0x4] ss:$16 sps:$4 sm:$0xff]   ;;  %v1950_v26 = vld [vmem:[%s2423_s12] ss:$16 sps:$4 sm:$0xff]   ;;  %v1998_v4 = vld [vmem:[%s2423_s12 + $0xc] ss:$16 sps:$4 sm:$0xff]  }
 0x13a   : > { %953 = vmatprep.subr.bf16.mxu1 %v1948_v25  ;;  %v1951_v27 = vld [vmem:[%s2423_s12 + $0x24] ss:$16 sps:$4 sm:$0xff]   ;;  %v1953_v28 = vld [vmem:[%s2423_s12 + $0x20] ss:$16 sps:$4 sm:$0xff]   ;;  %v1996_v7 = vld [vmem:[%s2423_s12 + $0x8] ss:$16 sps:$4 sm:$0xff]  }
 0x13b   : > { %954 = vmatpush1.bf16.msra.mxu1 %v1950_v26  ;;  %v1954_v29 = vld [vmem:[%s2423_s12 + $0x44] ss:$16 sps:$4 sm:$0xff]   ;;  %v1956_v30 = vld [vmem:[%s2423_s12 + $0x40] ss:$16 sps:$4 sm:$0xff]   ;;  %v2001_v8 = vld [vmem:[%s2423_s12 + $0x2c] ss:$16 sps:$4 sm:$0xff]  }
 0x13c   : > { %955 = vmatprep.subr.bf16.mxu1 %v1951_v27  ;;  %v1957_v31 = vld [vmem:[%s2423_s12 + $0x64] ss:$16 sps:$4 sm:$0xff]   ;;  %v1959_v32 = vld [vmem:[%s2423_s12 + $0x60] ss:$16 sps:$4 sm:$0xff]   ;;  %v1999_v11 = vld [vmem:[%s2423_s12 + $0x28] ss:$16 sps:$4 sm:$0xff]  }
 0x13d   : > { %v1960_v33 = vld [vmem:[%s2423_s12 + $0x84] ss:$16 sps:$4 sm:$0xff]   ;;  %v1962_v34 = vld [vmem:[%s2423_s12 + $0x80] ss:$16 sps:$4 sm:$0xff]   ;;  %v2004_v12 = vld [vmem:[%s2423_s12 + $0x4c] ss:$16 sps:$4 sm:$0xff]  }
 0x13e   : > { %v1963_v35 = vld [vmem:[%s2423_s12 + $0xa4] ss:$16 sps:$4 sm:$0xff]   ;;  %v1965_v36 = vld [vmem:[%s2423_s12 + $0xa0] ss:$16 sps:$4 sm:$0xff]   ;;  %v2002_v15 = vld [vmem:[%s2423_s12 + $0x48] ss:$16 sps:$4 sm:$0xff]  }
 0x13f   : > { %956 = vmatpush1.bf16.msra.mxu1 %v1953_v28  ;;  %v1966_v37 = vld [vmem:[%s2423_s12 + $0xc4] ss:$16 sps:$4 sm:$0xff]   ;;  %v2490_v38 = vld [vmem:[#allocation2 + $0x8] sm:$0xff]  ;;  %v1968_v39 = vld [vmem:[%s2423_s12 + $0xc0] ss:$16 sps:$4 sm:$0xff]   ;;  %p1866_p11 = scmp.ne.s32.totalorder %s2202_s17, 1 }
 0x140   : > { %957 = vmatprep.subr.bf16.mxu1 %v1954_v29  ;;  %985 = vmatprep.mubr.bf16.mxu1 %v2490_v38  ;;  %v1969_v40 = vld [vmem:[%s2423_s12 + $0xe4] ss:$16 sps:$4 sm:$0xff]   ;;  %v1971_v41 = vld [vmem:[%s2423_s12 + $0xe0] ss:$16 sps:$4 sm:$0xff]   ;;  %v2007_v16 = vld [vmem:[%s2423_s12 + $0x6c] ss:$16 sps:$4 sm:$0xff]  }
 0x141   : > { %v1972_v42 = vld [vmem:[%s2423_s12 + $0x104] ss:$16 sps:$4 sm:$0xff]   ;;  %v1974_v43 = vld [vmem:[%s2423_s12 + $0x100] ss:$16 sps:$4 sm:$0xff]   ;;  %v2005_v17 = vld [vmem:[%s2423_s12 + $0x68] ss:$16 sps:$4 sm:$0xff]  }
 0x142   : > { %v1975_v44 = vld [vmem:[%s2423_s12 + $0x124] ss:$16 sps:$4 sm:$0xff]   ;;  %v1977_v45 = vld [vmem:[%s2423_s12 + $0x120] ss:$16 sps:$4 sm:$0xff]   ;;  %v2010_v18 = vld [vmem:[%s2423_s12 + $0x8c] ss:$16 sps:$4 sm:$0xff]  }
 0x143   : > { %958 = vmatpush1.bf16.msra.mxu1 %v1956_v30  ;;  %v1978_v46 = vld [vmem:[%s2423_s12 + $0x144] ss:$16 sps:$4 sm:$0xff]   ;;  %v1980_v47 = vld [vmem:[%s2423_s12 + $0x140] ss:$16 sps:$4 sm:$0xff]   ;;  %v2008_v19 = vld [vmem:[%s2423_s12 + $0x88] ss:$16 sps:$4 sm:$0xff]  }
 0x144   : > { %959 = vmatprep.subr.bf16.mxu1 %v1957_v31  ;;  %v1981_v48 = vld [vmem:[%s2423_s12 + $0x164] ss:$16 sps:$4 sm:$0xff]   ;;  %v1983_v49 = vld [vmem:[%s2423_s12 + $0x160] ss:$16 sps:$4 sm:$0xff]   ;;  %v2013_v20 = vld [vmem:[%s2423_s12 + $0xac] ss:$16 sps:$4 sm:$0xff]  }
 0x145   : > { %v1984_v50 = vld [vmem:[%s2423_s12 + $0x184] ss:$16 sps:$4 sm:$0xff]   ;;  %v2046_v52 = vld [vmem:[%s2421_s11] ss:$8 sps:$4 sm:$0xff]   ;;  %v2049_v55 = vld [vmem:[%s2421_s11 + $0x10] ss:$8 sps:$4 sm:$0xff]  }
 0x146   : > { %v2044_v51 = vld [vmem:[%s2421_s11 + $0x4] ss:$8 sps:$4 sm:$0xff]   ;;  %v2047_v53 = vld [vmem:[%s2421_s11 + $0x14] ss:$8 sps:$4 sm:$0xff]   ;;  %v1986_v54 = vld [vmem:[%s2423_s12 + $0x180] ss:$16 sps:$4 sm:$0xff]  }
 0x147   : > { %960 = vmatpush1.bf16.msra.mxu1 %v1959_v32  ;;  %1487 = vmatprep.subr.bf16.mxu0 %v2044_v51  ;;  %v1987_v56 = vld [vmem:[%s2423_s12 + $0x1a4] ss:$16 sps:$4 sm:$0xff]   ;;  %v1989_v58 = vld [vmem:[%s2423_s12 + $0x1a0] ss:$16 sps:$4 sm:$0xff]   ;;  %v2011_v21 = vld [vmem:[%s2423_s12 + $0xa8] ss:$16 sps:$4 sm:$0xff]  }
 0x148   : > { %961 = vmatprep.subr.bf16.mxu1 %v1960_v33  ;;  %1488 = vmatpush1.bf16.msra.mxu0 %v2046_v52  ;;  %v2050_v57 = vld [vmem:[%s2421_s11 + $0x24] ss:$8 sps:$4 sm:$0xff]   ;;  %v2052_v59 = vld [vmem:[%s2421_s11 + $0x20] ss:$8 sps:$4 sm:$0xff]   ;;  %v2053_v61 = vld [vmem:[%s2421_s11 + $0x34] ss:$8 sps:$4 sm:$0xff]  }
 0x149   : > { %1489 = vmatprep.subr.bf16.mxu0 %v2047_v53  ;;  %v1990_v60 = vld [vmem:[%s2423_s12 + $0x1c4] ss:$16 sps:$4 sm:$0xff]   ;;  %v1992_v62 = vld [vmem:[%s2423_s12 + $0x1c0] ss:$16 sps:$4 sm:$0xff]   ;;  %v2016_v22 = vld [vmem:[%s2423_s12 + $0xcc] ss:$16 sps:$4 sm:$0xff]  }
 0x14a   : > { %v2055_v63 = vld [vmem:[%s2421_s11 + $0x30] ss:$8 sps:$4 sm:$0xff]   ;;  %v1993_v0 = vld [vmem:[%s2423_s12 + $0x1e4] ss:$16 sps:$4 sm:$0xff]   ;;  %v2058_v3 = vld [vmem:[%s2421_s11 + $0x40] ss:$8 sps:$4 sm:$0xff]  }
 0x14b   : > { %962 = vmatpush1.bf16.msra.mxu1 %v1962_v34  ;;  %v2056_v1 = vld [vmem:[%s2421_s11 + $0x44] ss:$8 sps:$4 sm:$0xff]   ;;  %v1995_v2 = vld [vmem:[%s2423_s12 + $0x1e0] ss:$16 sps:$4 sm:$0xff]   ;;  %v2059_v5 = vld [vmem:[%s2421_s11 + $0x54] ss:$8 sps:$4 sm:$0xff]  }
 0x14c   : > { %963 = vmatprep.subr.bf16.mxu1 %v1963_v35  ;;  %1490 = vmatpush1.bf16.msra.mxu0 %v2049_v55  ;;  %v2524_v6 = vld [vmem:[#allocation2] sm:$0xff]  ;;  %v2061_v9 = vld [vmem:[%s2421_s11 + $0x50] ss:$8 sps:$4 sm:$0xff]   ;;  %v2065_v14 = vld [vmem:[%s2421_s11 + $0x74] ss:$8 sps:$4 sm:$0xff]  }
 0x14d   : > { %1491 = vmatprep.subr.bf16.mxu0 %v2050_v57  ;;  %v2062_v10 = vld [vmem:[%s2421_s11 + $0x64] ss:$8 sps:$4 sm:$0xff]   ;;  %v2064_v13 = vld [vmem:[%s2421_s11 + $0x60] ss:$8 sps:$4 sm:$0xff]   ;;  %v2083_v53 = vld [vmem:[%s2421_s11 + $0xd4] ss:$8 sps:$4 sm:$0xff]  }
 0x14e   : > { %v2014_v23 = vld [vmem:[%s2423_s12 + $0xc8] ss:$16 sps:$4 sm:$0xff]   ;;  %v2019_v24 = vld [vmem:[%s2423_s12 + $0xec] ss:$16 sps:$4 sm:$0xff]  }
 0x14f   : > { %964 = vmatpush1.bf16.msra.mxu1 %v1965_v36  ;;  %v2017_v25 = vld [vmem:[%s2423_s12 + $0xe8] ss:$16 sps:$4 sm:$0xff]   ;;  %v2022_v26 = vld [vmem:[%s2423_s12 + $0x10c] ss:$16 sps:$4 sm:$0xff]  }
 0x150   : > { %965 = vmatprep.subr.bf16.mxu1 %v1966_v37  ;;  %1492 = vmatpush1.bf16.msra.mxu0 %v2052_v59  ;;  %v2020_v27 = vld [vmem:[%s2423_s12 + $0x108] ss:$16 sps:$4 sm:$0xff]   ;;  %v2025_v28 = vld [vmem:[%s2423_s12 + $0x12c] ss:$16 sps:$4 sm:$0xff]  }
 0x151   : > { %1493 = vmatprep.subr.bf16.mxu0 %v2053_v61  ;;  %v2023_v29 = vld [vmem:[%s2423_s12 + $0x128] ss:$16 sps:$4 sm:$0xff]   ;;  %v2028_v30 = vld [vmem:[%s2423_s12 + $0x14c] ss:$16 sps:$4 sm:$0xff]  }
 0x152   : > { %v2026_v31 = vld [vmem:[%s2423_s12 + $0x148] ss:$16 sps:$4 sm:$0xff]   ;;  %v2031_v32 = vld [vmem:[%s2423_s12 + $0x16c] ss:$16 sps:$4 sm:$0xff]  }
 0x153   : > { %966 = vmatpush1.bf16.msra.mxu1 %v1968_v39  ;;  %v2029_v33 = vld [vmem:[%s2423_s12 + $0x168] ss:$16 sps:$4 sm:$0xff]   ;;  %v2034_v34 = vld [vmem:[%s2423_s12 + $0x18c] ss:$16 sps:$4 sm:$0xff]  }
 0x154   : > { %967 = vmatprep.subr.bf16.mxu1 %v1969_v40  ;;  %1494 = vmatpush1.bf16.msra.mxu0 %v2055_v63  ;;  %v2032_v35 = vld [vmem:[%s2423_s12 + $0x188] ss:$16 sps:$4 sm:$0xff]   ;;  %v2037_v36 = vld [vmem:[%s2423_s12 + $0x1ac] ss:$16 sps:$4 sm:$0xff]  }
 0x155   : > { %1495 = vmatprep.subr.bf16.mxu0 %v2056_v1  ;;  %v2035_v37 = vld [vmem:[%s2423_s12 + $0x1a8] ss:$16 sps:$4 sm:$0xff]   ;;  %v2043_v40 = vld [vmem:[%s2423_s12 + $0x1ec] ss:$16 sps:$4 sm:$0xff]  }
 0x156   : > { %v2038_v39 = vld [vmem:[%s2423_s12 + $0x1c8] ss:$16 sps:$4 sm:$0xff]   ;;  %v2080_v51 = vld [vmem:[%s2421_s11 + $0xc4] ss:$8 sps:$4 sm:$0xff]   ;;  %v2089_v57 = vld [vmem:[%s2421_s11 + $0xf4] ss:$8 sps:$4 sm:$0xff]  }
 0x157   : > { %968 = vmatpush1.bf16.msra.mxu1 %v1971_v41  ;;  %v2041_v41 = vld [vmem:[%s2423_s12 + $0x1e8] ss:$16 sps:$4 sm:$0xff]   ;;  %v2086_v55 = vld [vmem:[%s2421_s11 + $0xe4] ss:$8 sps:$4 sm:$0xff]  }
 0x158   : > { %969 = vmatprep.subr.bf16.mxu1 %v1972_v42  ;;  %1496 = vmatpush1.bf16.msra.mxu0 %v2058_v3  ;;  %v2067_v42 = vld [vmem:[%s2421_s11 + $0x70] ss:$8 sps:$4 sm:$0xff]   ;;  %v2082_v52 = vld [vmem:[%s2421_s11 + $0xc0] ss:$8 sps:$4 sm:$0xff]   ;;  %v2094_v59 = vld [vmem:[%s2421_s11 + $0x104] ss:$8 sps:$4 sm:$0xff]  }
 0x159   : > { %1497 = vmatprep.subr.bf16.mxu0 %v2059_v5 }
 0x15b   : > { %970 = vmatpush1.bf16.msra.mxu1 %v1974_v43  ;;  %v2068_v43 = vld [vmem:[%s2421_s11 + $0x84] ss:$8 sps:$4 sm:$0xff]  }
 0x15c   : > { %971 = vmatprep.subr.bf16.mxu1 %v1975_v44  ;;  %1498 = vmatpush1.bf16.msra.mxu0 %v2061_v9  ;;  %v2070_v44 = vld [vmem:[%s2421_s11 + $0x80] ss:$8 sps:$4 sm:$0xff]  }
 0x15d   : > { %1499 = vmatprep.subr.bf16.mxu0 %v2062_v10 }
 0x15f   : > { %972 = vmatpush1.bf16.msra.mxu1 %v1977_v45  ;;  %v2071_v45 = vld [vmem:[%s2421_s11 + $0x94] ss:$8 sps:$4 sm:$0xff]  }
 0x160   : > { %973 = vmatprep.subr.bf16.mxu1 %v1978_v46  ;;  %1500 = vmatpush1.bf16.msra.mxu0 %v2064_v13  ;;  %v2073_v46 = vld [vmem:[%s2421_s11 + $0x90] ss:$8 sps:$4 sm:$0xff]  }
 0x161   : > { %1501 = vmatprep.subr.bf16.mxu0 %v2065_v14 }
 0x163   : > { %974 = vmatpush1.bf16.msra.mxu1 %v1980_v47  ;;  %v2074_v47 = vld [vmem:[%s2421_s11 + $0xa4] ss:$8 sps:$4 sm:$0xff]  }
 0x164   : > { %975 = vmatprep.subr.bf16.mxu1 %v1981_v48  ;;  %1502 = vmatpush1.bf16.msra.mxu0 %v2067_v42  ;;  %v2076_v48 = vld [vmem:[%s2421_s11 + $0xa0] ss:$8 sps:$4 sm:$0xff]   ;;  %v2121_v42 = vld [vmem:[%s2421_s11 + $0x194] ss:$8 sps:$4 sm:$0xff]  }
 0x165   : > { %1503 = vmatprep.subr.bf16.mxu0 %v2068_v43 }
 0x167   : > { %976 = vmatpush1.bf16.msra.mxu1 %v1983_v49  ;;  %v2077_v49 = vld [vmem:[%s2421_s11 + $0xb4] ss:$8 sps:$4 sm:$0xff]  }
 0x168   : > { %977 = vmatprep.subr.bf16.mxu1 %v1984_v50  ;;  %1504 = vmatpush1.bf16.msra.mxu0 %v2070_v44  ;;  %v2079_v50 = vld [vmem:[%s2421_s11 + $0xb0] ss:$8 sps:$4 sm:$0xff]  }
 0x169   : > { %1505 = vmatprep.subr.bf16.mxu0 %v2071_v45 }
 0x16b   : > { %978 = vmatpush1.bf16.msra.mxu1 %v1986_v54  ;;  %v2085_v54 = vld [vmem:[%s2421_s11 + $0xd0] ss:$8 sps:$4 sm:$0xff]  }
 0x16c   : > { %979 = vmatprep.subr.bf16.mxu1 %v1987_v56  ;;  %1506 = vmatpush1.bf16.msra.mxu0 %v2073_v46  ;;  %v2088_v56 = vld [vmem:[%s2421_s11 + $0xe0] ss:$8 sps:$4 sm:$0xff]  }
 0x16d   : > { %1507 = vmatprep.subr.bf16.mxu0 %v2074_v47 }
 0x16f   : > { %980 = vmatpush1.bf16.msra.mxu1 %v1989_v58  ;;  %v2091_v58 = vld [vmem:[%s2421_s11 + $0xf0] ss:$8 sps:$4 sm:$0xff]  }
 0x170   : > { %981 = vmatprep.subr.bf16.mxu1 %v1990_v60  ;;  %1508 = vmatpush1.bf16.msra.mxu0 %v2076_v48  ;;  %v2119_v48 = vld [vmem:[%s2421_s11 + $0x190] ss:$8 sps:$4 sm:$0xff]  }
 0x171   : > { %1509 = vmatprep.subr.bf16.mxu0 %v2077_v49  ;;  %v2124_v49 = vld [vmem:[%s2421_s11 + $0x1a4] ss:$8 sps:$4 sm:$0xff]  }
 0x173   : > { %982 = vmatpush1.bf16.msra.mxu1 %v1992_v62 }
 0x174   : > { %983 = vmatprep.subr.bf16.mxu1 %v1993_v0  ;;  %1510 = vmatpush1.bf16.msra.mxu0 %v2079_v50  ;;  %v2122_v50 = vld [vmem:[%s2421_s11 + $0x1a0] ss:$8 sps:$4 sm:$0xff]  }
 0x175   : > { %1511 = vmatprep.subr.bf16.mxu0 %v2080_v51  ;;  %v2127_v51 = vld [vmem:[%s2421_s11 + $0x1b4] ss:$8 sps:$4 sm:$0xff]  }
 0x177   : > { %984 = vmatpush1.bf16.msra.mxu1 %v1995_v2 }
 0x178   : > { %996 = vmatprep.subr.bf16.mxu1 %v1998_v4  ;;  %1512 = vmatpush1.bf16.msra.mxu0 %v2082_v52  ;;  %v2125_v52 = vld [vmem:[%s2421_s11 + $0x1b0] ss:$8 sps:$4 sm:$0xff]  }
 0x179   : > { %1513 = vmatprep.subr.bf16.mxu0 %v2083_v53 }
 0x17a   : > { %986 = vmatmul.mubr.bf16.vlgmr.msra.gmra.mrb[0].mxu1 %v2524_v6 }
 0x17b   : > { %997 = vmatpush1.bf16.msra.mxu1 %v1996_v7  ;;  %1028 = vmatprep.mubr.bf16.mxu1 %v2490_v38  ;;  %v2040_v38 = vld [vmem:[%s2423_s12 + $0x1cc] ss:$16 sps:$4 sm:$0xff]  }
 0x17c   : > { %998 = vmatprep.subr.bf16.mxu1 %v2001_v8  ;;  %1514 = vmatpush1.bf16.msra.mxu0 %v2085_v54  ;;  %v2130_v54 = vld [vmem:[%s2421_s11 + $0x1c4] ss:$8 sps:$4 sm:$0xff]  }
 0x17d   : > { %1515 = vmatprep.subr.bf16.mxu0 %v2086_v55 }
 0x17f   : > { %999 = vmatpush1.bf16.msra.mxu1 %v1999_v11 }
 0x180   : > { %1000 = vmatprep.subr.bf16.mxu1 %v2004_v12  ;;  %1516 = vmatpush1.bf16.msra.mxu0 %v2088_v56 }
 0x181   : > { %1517 = vmatprep.subr.bf16.mxu0 %v2089_v57 }
 0x183   : > { %1001 = vmatpush1.bf16.msra.mxu1 %v2002_v15 }
 0x184   : > { %1002 = vmatprep.subr.bf16.mxu1 %v2007_v16  ;;  %1518 = vmatpush1.bf16.msra.mxu0 %v2091_v58 }
 0x185   : > { %1530 = vmatprep.subr.bf16.mxu0 %v2094_v59 }
 0x187   : > { %1003 = vmatpush1.bf16.msra.mxu1 %v2005_v17 }
 0x188   : > { %1004 = vmatprep.subr.bf16.mxu1 %v2010_v18 }
 0x18b   : > { %1005 = vmatpush1.bf16.msra.mxu1 %v2008_v19 }
 0x18c   : > { %1006 = vmatprep.subr.bf16.mxu1 %v2013_v20 }
 0x18f   : > { %1007 = vmatpush1.bf16.msra.mxu1 %v2011_v21 }
 0x190   : > { %1008 = vmatprep.subr.bf16.mxu1 %v2016_v22  ;;  %v2092_v22 = vld [vmem:[%s2421_s11 + $0x100] ss:$8 sps:$4 sm:$0xff]  }
 0x193   : > { %1009 = vmatpush1.bf16.msra.mxu1 %v2014_v23  ;;  %v2097_v23 = vld [vmem:[%s2421_s11 + $0x114] ss:$8 sps:$4 sm:$0xff]  }
 0x194   : > { %1010 = vmatprep.subr.bf16.mxu1 %v2019_v24  ;;  %v2095_v24 = vld [vmem:[%s2421_s11 + $0x110] ss:$8 sps:$4 sm:$0xff]  }
 0x197   : > { %1011 = vmatpush1.bf16.msra.mxu1 %v2017_v25  ;;  %v2100_v25 = vld [vmem:[%s2421_s11 + $0x124] ss:$8 sps:$4 sm:$0xff]  }
 0x198   : > { %1012 = vmatprep.subr.bf16.mxu1 %v2022_v26  ;;  %v2098_v26 = vld [vmem:[%s2421_s11 + $0x120] ss:$8 sps:$4 sm:$0xff]  }
 0x19b   : > { %1013 = vmatpush1.bf16.msra.mxu1 %v2020_v27  ;;  %v2103_v27 = vld [vmem:[%s2421_s11 + $0x134] ss:$8 sps:$4 sm:$0xff]  }
 0x19c   : > { %1014 = vmatprep.subr.bf16.mxu1 %v2025_v28  ;;  %v2101_v28 = vld [vmem:[%s2421_s11 + $0x130] ss:$8 sps:$4 sm:$0xff]  }
 0x19f   : > { %1015 = vmatpush1.bf16.msra.mxu1 %v2023_v29  ;;  %v2106_v29 = vld [vmem:[%s2421_s11 + $0x144] ss:$8 sps:$4 sm:$0xff]  }
 0x1a0   : > { %1016 = vmatprep.subr.bf16.mxu1 %v2028_v30  ;;  %v2104_v30 = vld [vmem:[%s2421_s11 + $0x140] ss:$8 sps:$4 sm:$0xff]  }
 0x1a3   : > { %1017 = vmatpush1.bf16.msra.mxu1 %v2026_v31  ;;  %v2109_v31 = vld [vmem:[%s2421_s11 + $0x154] ss:$8 sps:$4 sm:$0xff]  }
 0x1a4   : > { %1018 = vmatprep.subr.bf16.mxu1 %v2031_v32  ;;  %v2107_v32 = vld [vmem:[%s2421_s11 + $0x150] ss:$8 sps:$4 sm:$0xff]  }
 0x1a7   : > { %1019 = vmatpush1.bf16.msra.mxu1 %v2029_v33  ;;  %v2112_v33 = vld [vmem:[%s2421_s11 + $0x164] ss:$8 sps:$4 sm:$0xff]  }
 0x1a8   : > { %1020 = vmatprep.subr.bf16.mxu1 %v2034_v34  ;;  %v2110_v34 = vld [vmem:[%s2421_s11 + $0x160] ss:$8 sps:$4 sm:$0xff]  }
 0x1ab   : > { %1021 = vmatpush1.bf16.msra.mxu1 %v2032_v35  ;;  %v2115_v35 = vld [vmem:[%s2421_s11 + $0x174] ss:$8 sps:$4 sm:$0xff]  }
 0x1ac   : > { %1022 = vmatprep.subr.bf16.mxu1 %v2037_v36  ;;  %v2113_v36 = vld [vmem:[%s2421_s11 + $0x170] ss:$8 sps:$4 sm:$0xff]  }
 0x1af   : > { %1023 = vmatpush1.bf16.msra.mxu1 %v2035_v37  ;;  %v2118_v37 = vld [vmem:[%s2421_s11 + $0x184] ss:$8 sps:$4 sm:$0xff]  }
 0x1b0   : > { %1024 = vmatprep.subr.bf16.mxu1 %v2040_v38 }
 0x1b3   : > { %1025 = vmatpush1.bf16.msra.mxu1 %v2038_v39  ;;  %v2116_v39 = vld [vmem:[%s2421_s11 + $0x180] ss:$8 sps:$4 sm:$0xff]  }
 0x1b4   : > { %1026 = vmatprep.subr.bf16.mxu1 %v2043_v40 }
 0x1b7   : > { %1027 = vmatpush1.bf16.msra.mxu1 %v2041_v41 }
 0x1ba   : > { %1029 = vmatmul.mubr.bf16.vlgmr.msra.gmra.mrb[4].mxu1 %v2524_v6 }
 0x24d   : > { %v987_v60 = vpop.f32.mrb[0].mxu1 }
 0x24e   : > { %v1794_v61 = vmul.f32 -1.442695, %v987_v60  ;;  %v989_v62 = vpop.f32.mrb[1].mxu1 }
 0x24f   : > { %v1795_v63 = vmul.f32 -1.442695, %v989_v62  ;;  %v991_v0 = vpop.f32.mrb[2].mxu1 }
 0x250   : > { %2140 = vpow2.f32 %v1794_v61  ;;  %v1798_v1 = vmul.f32 -1.442695, %v991_v0  ;;  %v993_v2 = vpop.f32.mrb[3].mxu1  ;;  %v2128_v61 = vld [vmem:[%s2421_s11 + $0x1c0] ss:$8 sps:$4 sm:$0xff]  }
 0x251   : > { %2142 = vpow2.f32 %v1795_v63  ;;  %v1799_v3 = vmul.f32 -1.442695, %v993_v2  ;;  %v2133_v63 = vld [vmem:[%s2421_s11 + $0x1d4] ss:$8 sps:$4 sm:$0xff]  }
 0x252   : > { %2144 = vpow2.f32 %v1798_v1  ;;  %v2136_v1 = vld [vmem:[%s2421_s11 + $0x1e4] ss:$8 sps:$4 sm:$0xff]  }
 0x253   : > { %2146 = vpow2.f32 %v1799_v3  ;;  %v2139_v3 = vld [vmem:[%s2421_s11 + $0x1f4] ss:$8 sps:$4 sm:$0xff]  }
 0x25a   : > { %v2141_v4 = vpop.eup %2140 }
 0x25b   : > { %v2143_v5 = vpop.eup %2142  ;;  %v1063_v6 = vadd.f32 1.0, %v2141_v4 }
 0x25c   : > { %v2145_v7 = vpop.eup %2144  ;;  %v1064_v8 = vadd.f32 1.0, %v2143_v5 }
 0x25d   : > { %v2147_v9 = vpop.eup %2146  ;;  %2148 = vrcp.f32 %v1063_v6  ;;  %v1067_v10 = vadd.f32 1.0, %v2145_v7  ;;  %v2137_v7 = vld [vmem:[%s2421_s11 + $0x1f0] ss:$8 sps:$4 sm:$0xff]  }
 0x25e   : > { %2150 = vrcp.f32 %v1064_v8  ;;  %v1068_v11 = vadd.f32 1.0, %v2147_v9 }
 0x25f   : > { %2152 = vrcp.f32 %v1067_v10 }
 0x260   : > { %2154 = vrcp.f32 %v1068_v11 }
 0x267   : > { %v2149_v12 = vpop.eup %2148 }
 0x268   : > { %v2151_v13 = vpop.eup %2150  ;;  %v1087_v16 = vmul.f32 %v2149_v12, %v987_v60 }
 0x269   : > { %v2153_v14 = vpop.eup %2152  ;;  %v1088_v18 = vmul.f32 %v2151_v13, %v989_v62 }
 0x26a   : > { %v2155_v15 = vpop.eup %2154  ;;  %v1091_v17 = vmul.f32 %v2153_v14, %v991_v0  ;;  %v2131_v0 = vld [vmem:[%s2421_s11 + $0x1d0] ss:$8 sps:$4 sm:$0xff]  }
 0x26b   : > { %v1092_v19 = vmul.f32 %v2155_v15, %v993_v2  ;;  %v2134_v2 = vld [vmem:[%s2421_s11 + $0x1e0] ss:$8 sps:$4 sm:$0xff]   ;;  %v1095_v15 = vld [vmem:[#allocation3] sm:$0xff] }
 0x26c   : > { %v1099_v20 = vpack.c.bf16 %v1091_v17, %v1087_v16  ;;  %v1096_v16 = vld [vmem:[#allocation3 + $0x8] sm:$0xff] }
 0x26d   : > { %v1100_v21 = vpack.c.bf16 %v1092_v19, %v1088_v18  ;;  %v1097_v18 = vld [vmem:[#allocation3 + $0x10] sm:$0xff] }
 0x26f   : > { %1519 = vmatprep.mubr.bf16.mxu0 %v1100_v21  ;;  %v1098_v21 = vld [vmem:[#allocation3 + $0x18] sm:$0xff] }
 0x270   : > { %1520 = vmatmul.mubr.bf16.vlgmr.msra.gmra.mrb[0].mxu0 %v1099_v20 }
 0x271   : > { %1531 = vmatpush1.bf16.msra.mxu0 %v2092_v22 }
 0x272   : > { %1532 = vmatprep.subr.bf16.mxu0 %v2097_v23 }
 0x275   : > { %1533 = vmatpush1.bf16.msra.mxu0 %v2095_v24 }
 0x276   : > { %1534 = vmatprep.subr.bf16.mxu0 %v2100_v25 }
 0x279   : > { %1535 = vmatpush1.bf16.msra.mxu0 %v2098_v26 }
 0x27a   : > { %1536 = vmatprep.subr.bf16.mxu0 %v2103_v27 }
 0x27d   : > { %1537 = vmatpush1.bf16.msra.mxu0 %v2101_v28 }
 0x27e   : > { %1538 = vmatprep.subr.bf16.mxu0 %v2106_v29 }
 0x281   : > { %1539 = vmatpush1.bf16.msra.mxu0 %v2104_v30 }
 0x282   : > { %1540 = vmatprep.subr.bf16.mxu0 %v2109_v31 }
 0x285   : > { %1541 = vmatpush1.bf16.msra.mxu0 %v2107_v32 }
 0x286   : > { %1542 = vmatprep.subr.bf16.mxu0 %v2112_v33 }
 0x289   : > { %1543 = vmatpush1.bf16.msra.mxu0 %v2110_v34 }
 0x28a   : > { %1544 = vmatprep.subr.bf16.mxu0 %v2115_v35 }
 0x28d   : > { %v1030_v38 = vpop.f32.mrb[4].mxu1  ;;  %1545 = vmatpush1.bf16.msra.mxu0 %v2113_v36 }
 0x28e   : > { %v1796_v40 = vmul.f32 -1.442695, %v1030_v38  ;;  %v1032_v41 = vpop.f32.mrb[5].mxu1  ;;  %1546 = vmatprep.subr.bf16.mxu0 %v2118_v37 }
 0x28f   : > { %v1797_v43 = vmul.f32 -1.442695, %v1032_v41  ;;  %v1034_v44 = vpop.f32.mrb[6].mxu1 }
 0x290   : > { %2156 = vpow2.f32 %v1796_v40  ;;  %v1800_v45 = vmul.f32 -1.442695, %v1034_v44  ;;  %v1036_v46 = vpop.f32.mrb[7].mxu1 }
 0x291   : > { %2158 = vpow2.f32 %v1797_v43  ;;  %v1801_v47 = vmul.f32 -1.442695, %v1036_v46  ;;  %1547 = vmatpush1.bf16.msra.mxu0 %v2116_v39 }
 0x292   : > { %2160 = vpow2.f32 %v1800_v45  ;;  %1548 = vmatprep.subr.bf16.mxu0 %v2121_v42 }
 0x293   : > { %2162 = vpow2.f32 %v1801_v47 }
 0x295   : > { %1549 = vmatpush1.bf16.msra.mxu0 %v2119_v48 }
 0x296   : > { %1550 = vmatprep.subr.bf16.mxu0 %v2124_v49 }
 0x299   : > { %1551 = vmatpush1.bf16.msra.mxu0 %v2122_v50 }
 0x29a   : > { %v2157_v53 = vpop.eup %2156  ;;  %1552 = vmatprep.subr.bf16.mxu0 %v2127_v51 }
 0x29b   : > { %v2159_v55 = vpop.eup %2158  ;;  %v1065_v56 = vadd.f32 1.0, %v2157_v53 }
 0x29c   : > { %v2161_v57 = vpop.eup %2160  ;;  %v1066_v58 = vadd.f32 1.0, %v2159_v55 }
 0x29d   : > { %v2163_v59 = vpop.eup %2162  ;;  %2164 = vrcp.f32 %v1065_v56  ;;  %v1069_v60 = vadd.f32 1.0, %v2161_v57  ;;  %1553 = vmatpush1.bf16.msra.mxu0 %v2125_v52 }
 0x29e   : > { %2166 = vrcp.f32 %v1066_v58  ;;  %v1070_v62 = vadd.f32 1.0, %v2163_v59  ;;  %1554 = vmatprep.subr.bf16.mxu0 %v2130_v54 }
 0x29f   : > { %2168 = vrcp.f32 %v1069_v60 }
 0x2a0   : > { %2170 = vrcp.f32 %v1070_v62 }
 0x2a1   : > { %1555 = vmatpush1.bf16.msra.mxu0 %v2128_v61 }
 0x2a2   : > { %1556 = vmatprep.subr.bf16.mxu0 %v2133_v63 }
 0x2a5   : > { %1557 = vmatpush1.bf16.msra.mxu0 %v2131_v0 }
 0x2a6   : > { %1558 = vmatprep.subr.bf16.mxu0 %v2136_v1 }
 0x2a7   : > { %v2165_v4 = vpop.eup %2164 }
 0x2a8   : > { %v2167_v5 = vpop.eup %2166  ;;  %v1089_v9 = vmul.f32 %v2165_v4, %v1030_v38 }
 0x2a9   : > { %v2169_v6 = vpop.eup %2168  ;;  %1559 = vmatpush1.bf16.msra.mxu0 %v2134_v2  ;;  %v1090_v11 = vmul.f32 %v2167_v5, %v1032_v41 }
 0x2aa   : > { %v2171_v8 = vpop.eup %2170  ;;  %v1093_v10 = vmul.f32 %v2169_v6, %v1034_v44  ;;  %1560 = vmatprep.subr.bf16.mxu0 %v2139_v3 }
 0x2ab   : > { %v1094_v12 = vmul.f32 %v2171_v8, %v1036_v46 }
 0x2ac   : > { %v1101_v13 = vpack.c.bf16 %v1093_v10, %v1089_v9 }
 0x2ad   : > { %v1102_v14 = vpack.c.bf16 %v1094_v12, %v1090_v11  ;;  %1561 = vmatpush1.bf16.msra.mxu0 %v2137_v7 }
 0x2af   : > { %1562 = vmatprep.mubr.bf16.mxu0 %v1102_v14 }
 0x2b0   : > { %1563 = vmatmul.mubr.bf16.vlgmr.msra.gmra.mrb[0].mxu0 %v1101_v13 }
 0x383   : > { %v1564_v17 = vpop.f32.mrb[0].mxu0  ;;  %1584 = sbr.rel (%p1866_p11) target bundleno = 916 (0x394), region = 67 }
 0x384   : > { %v1573_v19 = vadd.f32 %v1564_v17, %v1095_v15  ;;  %v1566_v20 = vpop.f32.mrb[1].mxu0 }
 0x385   : > { %v1574_v22 = vadd.f32 %v1566_v20, %v1096_v16  ;;  %v1568_v23 = vpop.f32.mrb[2].mxu0 }
 0x386   : > { %1577 = vst [vmem:[#allocation3] sm:$0xff] %v1573_v19  ;;  %v1575_v24 = vadd.f32 %v1568_v23, %v1097_v18  ;;  %v1570_v25 = vpop.f32.mrb[3].mxu0 }
 0x387   : > { %1578 = vst [vmem:[#allocation3 + $0x8] sm:$0xff] %v1574_v22  ;;  %v1576_v26 = vadd.f32 %v1570_v25, %v1098_v21 }
 0x388   : > { %1579 = vst [vmem:[#allocation3 + $0x10] sm:$0xff] %v1575_v24 }
 0x389   : > { %1580 = vst [vmem:[#allocation3 + $0x18] sm:$0xff] %v1576_v26 }
 0x38d   : > { %v1585_v27 = vld [vmem:[#allocation3] sm:$0xff] }
 0x38e   : > { %v1586_v28 = vld [vmem:[#allocation3 + $0x8] sm:$0xff] }
 0x38f   : > { %v1587_v29 = vld [vmem:[#allocation3 + $0x10] sm:$0xff]  ;;  %v1875_v30 = vpack.c.bf16 %v1586_v28, %v1585_v27 }
 0x390   : > { %v1588_v31 = vld [vmem:[#allocation3 + $0x18] sm:$0xff] }
 0x391   : > { %v1876_v32 = vpack.c.bf16 %v1588_v31, %v1587_v29  ;;  %1601 = vst [vmem:[%s2639_s4] sm:$0xff] %v1875_v30 }
 0x393   : > { %1602 = vst [vmem:[%s2639_s4 + $0x8] sm:$0xff] %v1876_v32 }
 0x394 PF: > { %s14_s19 = sadd.s32 1, %s2210_s19   ;;  %s2640_s15 = smov %s2198_s16 }
 0x395   : > { %p11_p12 = scmp.ge.s32.totalorder %s14_s19, 4   ;;  %s2641_s16 = smov %s2274_s23 }
 0x396   : > { %s2642_s17 = smov %s2206_s18  ;;  %s2643_s18 = smov %s2645_s20 }
 0x397   :  { %13 = sbr.rel (!%p11_p12) target bundleno = 3 (0x3), region = 108 }

</bundles_post_ra>
